<compile_context>
chip_gen: v5e
topology: v5e:2x2
jax: 0.10.0
libtpu: 0.0.40
codegen_flags: <defaults>
</compile_context>

<pallas_src>
import functools
import math

import jax
import jax.numpy as jnp
import numpy as np
from jax import lax
from jax.experimental import pallas as pl
from jax.experimental.pallas import tpu as pltpu


# --------------------------------------------------------------------------
# small helpers
# --------------------------------------------------------------------------
def _gelu_tanh(x):
    # GELU with tanh approximation (matches nn.GELU(approximate='tanh')).
    c = math.sqrt(2.0 / math.pi)
    return 0.5 * x * (1.0 + jnp.tanh(c * (x + 0.044715 * x * x * x)))


def _layernorm(v, g, b, eps=1e-5):
    # Single-pass LayerNorm: one reduction pass for E[x] and E[x^2].
    mu = jnp.mean(v, axis=-1, keepdims=True)
    ms = jnp.mean(v * v, axis=-1, keepdims=True)
    var = ms - mu * mu
    return (v - mu) * lax.rsqrt(var + eps) * g + b


def _pick_head_group(n_head, hd):
    """Largest divisor g of n_head with g*hd <= 256 (MXU-width head groups)."""
    best = 1
    for g in range(1, n_head + 1):
        if n_head % g == 0 and g * hd <= 256:
            best = g
    return best


def _pick_mlp_chunk(c4):
    """Hidden-dim chunk: whole thing if small, else a lane-aligned divisor."""
    if c4 <= 1024:
        return c4
    for ch in (1024, 768, 512, 384, 256, 128):
        if c4 % ch == 0:
            return ch
    return c4


@functools.lru_cache(maxsize=None)
def _gelu_in_bf16():
    """bf16 element-wise GELU only on generations with bf16 VPU/EUP (v6e/v7x)."""
    try:
        kind = jax.devices()[0].device_kind.lower()
    except Exception:
        return False
    return ("v6" in kind) or ("v7" in kind)


def _weight_layout(C, n_head):
    """(shape, dtype) of every prepared weight, in kernel argument order."""
    hd = C // n_head
    G = _pick_head_group(n_head, hd)
    ng = n_head // G
    ghd = G * hd
    bf16, f32 = jnp.bfloat16, jnp.float32
    return (
        ((1, C), f32), ((1, C), f32),                                   # ln1 g,b
        ((ng, C, ghd), bf16), ((ng, C, ghd), bf16), ((ng, C, ghd), bf16),  # wq wk wv
        ((ng, 1, ghd), f32), ((ng, 1, ghd), f32), ((ng, 1, ghd), f32),     # bq bk bv
        ((ng, ghd, C), bf16), ((1, C), f32),                            # wpj, bpj
        ((1, C), f32), ((1, C), f32),                                   # ln2 g,b
        ((C, 4 * C), bf16), ((1, 4 * C), f32),                          # wfc, bfc
        ((4 * C, C), bf16), ((1, C), f32),                              # wfp, bfp
    )


def _vmem_limit_bytes(T, C, n_head, weight_bytes):
    """Generation-aware scoped-VMEM limit from the actual footprint."""
    hd = C // n_head
    G = _pick_head_group(n_head, hd)
    ghd = G * hd
    ch = _pick_mlp_chunk(4 * C)
    # x/out tiles (double-buffered), scratch, LN/residual temps, per-group
    # qkv, per-head scores/probs, one MLP hidden chunk.
    act = 4 * (12 * T * C + (G + 2) * T * T + 6 * T * ghd + 4 * T * ch)
    est = 2 * weight_bytes + act + (4 << 20)
    try:
        cap = int(pltpu.get_tpu_info().vmem_capacity_bytes)
    except Exception:
        cap = 64 << 20                       # conservative (valid on v7x too)
    cap = max(cap, 64 << 20)
    return int(min(max(est, 32 << 20), cap - (8 << 20)))


# --------------------------------------------------------------------------
# kernel
# --------------------------------------------------------------------------
def _make_block_kernel(T, C, n_head, gelu_bf16):
    hd = C // n_head
    G = _pick_head_group(n_head, hd)
    ng = n_head // G
    c4 = 4 * C
    ch = _pick_mlp_chunk(c4)
    n_chunks = c4 // ch
    bf16 = jnp.bfloat16
    gelu_dtype = jnp.bfloat16 if gelu_bf16 else jnp.float32

    def kernel(x_ref,
               ln1g_ref, ln1b_ref,
               wq_ref, wk_ref, wv_ref,
               bq_ref, bk_ref, bv_ref,
               wpj_ref, bpj_ref,
               ln2g_ref, ln2b_ref,
               wfc_ref, bfc_ref,
               wfp_ref, bfp_ref,
               o_ref, acc_ref):
        x = x_ref[0]                                          # (T, C) f32

        # ---- attention branch -------------------------------------------
        h1b = _layernorm(x, ln1g_ref[...], ln1b_ref[...]).astype(bf16)

        row = lax.broadcasted_iota(jnp.int32, (T, T), 0)
        col = lax.broadcasted_iota(jnp.int32, (T, T), 1)
        causal = col <= row                                   # (T, T) bool

        acc_ref[...] = jnp.zeros((T, C), jnp.float32)

        def attn_group(g, carry):
            # 128/256-wide grouped QKV projections (1/sqrt(hd) folded in wq/bq).
            qg = (jnp.dot(h1b, wq_ref[g], preferred_element_type=jnp.float32)
                  + bq_ref[g]).astype(bf16)                   # (T, G*hd)
            kg = (jnp.dot(h1b, wk_ref[g], preferred_element_type=jnp.float32)
                  + bk_ref[g]).astype(bf16)
            vg = (jnp.dot(h1b, wv_ref[g], preferred_element_type=jnp.float32)
                  + bv_ref[g]).astype(bf16)

            heads = []
            for h in range(G):                                # small static unroll
                lo = h * hd
                qh = qg[:, lo:lo + hd]
                kh = kg[:, lo:lo + hd]
                vh = vg[:, lo:lo + hd]
                # scores: contract last dims of both operands (no .T relayout).
                s = lax.dot_general(qh, kh, (((1,), (1,)), ((), ())),
                                    preferred_element_type=jnp.float32)  # (T, T)
                s = jnp.where(causal, s, -1e30)
                m = jnp.max(s, axis=-1, keepdims=True)
                p = jnp.exp(s - m)
                inv = pl.reciprocal(jnp.sum(p, axis=-1, keepdims=True),
                                    approx=True)
                oh = jnp.dot(p.astype(bf16), vh,
                             preferred_element_type=jnp.float32) * inv  # (T, hd)
                heads.append(oh.astype(bf16))

            og = heads[0] if G == 1 else jnp.concatenate(heads, axis=-1)  # (T, G*hd)
            # grouped c_proj partial product: (T, G*hd) x (G*hd, C)
            acc_ref[...] += jnp.dot(og, wpj_ref[g],
                                    preferred_element_type=jnp.float32)
            return carry

        lax.fori_loop(0, ng, attn_group, 0)

        x1 = x + acc_ref[...] + bpj_ref[...]                   # residual, f32

        # ---- MLP branch ---------------------------------------------------
        h2b = _layernorm(x1, ln2g_ref[...], ln2b_ref[...]).astype(bf16)
        acc_ref[...] = jnp.zeros((T, C), jnp.float32)

        if n_chunks == 1:
            f = jnp.dot(h2b, wfc_ref[...],
                        preferred_element_type=jnp.float32) + bfc_ref[...]
            f = _gelu_tanh(f.astype(gelu_dtype))
            acc_ref[...] += jnp.dot(f.astype(bf16), wfp_ref[...],
                                    preferred_element_type=jnp.float32)
        else:
            def mlp_chunk(j, carry):
                c0 = pl.multiple_of(j * ch, 128)               # lane-aligned start
                w1 = wfc_ref[:, pl.ds(c0, ch)]                 # (C, ch) bf16
                b1 = bfc_ref[:, pl.ds(c0, ch)]                 # (1, ch) f32
                f = jnp.dot(h2b, w1,
                            preferred_element_type=jnp.float32) + b1   # (T, ch)
                f = _gelu_tanh(f.astype(gelu_dtype))
                acc_ref[...] += jnp.dot(f.astype(bf16), wfp_ref[pl.ds(c0, ch), :],
                                        preferred_element_type=jnp.float32)
                return carry

            lax.fori_loop(0, n_chunks, mlp_chunk, 0)

        o_ref[0] = (x1 + acc_ref[...] + bfp_ref[...]).astype(o_ref.dtype)

    return kernel


# --------------------------------------------------------------------------
# host-side weight preparation (done ONCE, outside the per-call path)
# --------------------------------------------------------------------------
def prepare_block_params(params, n_head):
    """Relayout / transpose / bf16-cast weights into MXU-friendly group slabs."""
    C = params["ln1_g"].shape[-1]
    hd = C // n_head
    G = _pick_head_group(n_head, hd)
    ng = n_head // G
    ghd = G * hd
    bf16, f32 = jnp.bfloat16, jnp.float32
    scale = 1.0 / math.sqrt(hd)                  # folded into wq / bq

    w_attn = params["w_attn"]                    # (3C, C), torch Linear (out, in)
    b_attn = params["b_attn"].reshape(3 * C)

    def w_slab(w_out_in, scl=1.0):               # (C,C) (out,in) -> (ng, C, ghd)
        wt = (w_out_in * scl).T                  # (C_in, C_out)
        return jnp.transpose(wt.reshape(C, ng, ghd), (1, 0, 2)).astype(bf16)

    def b_slab(b, scl=1.0):
        return (b * scl).reshape(ng, 1, ghd).astype(f32)

    wq = w_slab(w_attn[0 * C:1 * C], scale)
    wk = w_slab(w_attn[1 * C:2 * C])
    wv = w_slab(w_attn[2 * C:3 * C])
    bq = b_slab(b_attn[0 * C:1 * C], scale)
    bk = b_slab(b_attn[1 * C:2 * C])
    bv = b_slab(b_attn[2 * C:3 * C])

    # y = concat_h(out_h) @ w_proj.T == sum_g og @ wpj[g],  wpj[g]: (ghd, C)
    wpj = params["w_proj"].T.reshape(ng, ghd, C).astype(bf16)
    bpj = params["b_proj"].reshape(1, C).astype(f32)

    wfc = params["w_fc"].T.astype(bf16)          # (C, 4C)
    bfc = params["b_fc"].reshape(1, 4 * C).astype(f32)
    wfp = params["w_fcp"].T.astype(bf16)         # (4C, C)
    bfp = params["b_fcp"].reshape(1, C).astype(f32)

    ln1g = params["ln1_g"].reshape(1, C).astype(f32)
    ln1b = params["ln1_b"].reshape(1, C).astype(f32)
    ln2g = params["ln2_g"].reshape(1, C).astype(f32)
    ln2b = params["ln2_b"].reshape(1, C).astype(f32)

    return (ln1g, ln1b, wq, wk, wv, bq, bk, bv, wpj, bpj,
            ln2g, ln2b, wfc, bfc, wfp, bfp)


# --------------------------------------------------------------------------
# pallas_call builder (cached per shape; jit-wrapped so it compiles once)
# --------------------------------------------------------------------------
@functools.lru_cache(maxsize=None)
def _build_block_call(B, T, C, n_head, dtype_name, gelu_bf16, single_buffer):
    out_dtype = np.dtype(dtype_name)
    layout = _weight_layout(C, n_head)
    weight_bytes = sum(int(np.prod(s)) * np.dtype(d).itemsize for s, d in layout)

    def weight_spec(shape):
        nd = len(shape)
        idx = lambda b, _nd=nd: (0,) * _nd       # constant: resident across B grid
        if single_buffer and hasattr(pl, "Buffered"):
            # Single-buffer resident weights: constant index_map means the
            # second pipeline buffer would only duplicate VMEM.
            return pl.BlockSpec(shape, idx, pipeline_mode=pl.Buffered(1))
        return pl.BlockSpec(shape, idx)

    in_specs = [pl.BlockSpec((1, T, C), lambda b: (b, 0, 0))]
    in_specs += [weight_spec(s) for s, _ in layout]

    call = pl.pallas_call(
        _make_block_kernel(T, C, n_head, gelu_bf16),
        out_shape=jax.ShapeDtypeStruct((B, T, C), out_dtype),
        grid=(B,),
        in_specs=in_specs,
        out_specs=pl.BlockSpec((1, T, C), lambda b: (b, 0, 0)),
        scratch_shapes=[pltpu.VMEM((T, C), jnp.float32)],
        compiler_params=pltpu.CompilerParams(
            dimension_semantics=("parallel",),
            vmem_limit_bytes=_vmem_limit_bytes(T, C, n_head, weight_bytes)),
    )
    return jax.jit(call)


_SINGLE_BUFFER_WEIGHTS = True    # flipped once if the runtime rejects Buffered(1)


def block_forward(x, prepared, n_head):
    """Forward pass; `prepared` is the tuple from prepare_block_params()."""
    global _SINGLE_BUFFER_WEIGHTS
    B, T, C = x.shape
    gelu_bf16 = _gelu_in_bf16()
    args = (x,) + tuple(prepared)
    if _SINGLE_BUFFER_WEIGHTS:
        try:
            fn = _build_block_call(B, T, C, n_head, str(x.dtype), gelu_bf16, True)
            return fn(*args)
        except Exception:
            _SINGLE_BUFFER_WEIGHTS = False       # fall back to default buffering
    fn = _build_block_call(B, T, C, n_head, str(x.dtype), gelu_bf16, False)
    return fn(*args)


# --------------------------------------------------------------------------
# pure-JAX f32 reference (PyTorch Block.forward, eval mode)
# --------------------------------------------------------------------------
def block_reference(x, params, n_head):
    B, T, C = x.shape
    hd = C // n_head

    def ref_ln(v, g, b, eps=1e-5):
        mu = jnp.mean(v, axis=-1, keepdims=True)
        var = jnp.mean((v - mu) ** 2, axis=-1, keepdims=True)
        return (v - mu) * lax.rsqrt(var + eps) * g + b

    h = ref_ln(x, params["ln1_g"][0], params["ln1_b"][0])
    qkv = jnp.einsum("btc,oc->bto", h, params["w_attn"]) + params["b_attn"][0]
    q, k, v = jnp.split(qkv, 3, axis=-1)
    q = q.reshape(B, T, n_head, hd).transpose(0, 2, 1, 3)
    k = k.reshape(B, T, n_head, hd).transpose(0, 2, 1, 3)
    v = v.reshape(B, T, n_head, hd).transpose(0, 2, 1, 3)
    s = jnp.einsum("bhtd,bhsd->bhts", q, k) / math.sqrt(hd)
    mask = jnp.tril(jnp.ones((T, T), bool))
    s = jnp.where(mask, s, -1e30)
    p = jax.nn.softmax(s, axis=-1)
    y = jnp.einsum("bhts,bhsd->bhtd", p, v)
    y = y.transpose(0, 2, 1, 3).reshape(B, T, C)
    y = jnp.einsum("btc,oc->bto", y, params["w_proj"]) + params["b_proj"][0]
    x1 = x + y

    h2 = ref_ln(x1, params["ln2_g"][0], params["ln2_b"][0])
    f = jnp.einsum("btc,oc->bto", h2, params["w_fc"]) + params["b_fc"][0]
    f = _gelu_tanh(f)
    f = jnp.einsum("btc,oc->bto", f, params["w_fcp"]) + params["b_fcp"][0]
    return x1 + f


def init_params(key, n_embd):
    C = n_embd
    ks = jax.random.split(key, 12)
    std = 0.02
    p = {
        "ln1_g": 1.0 + 0.01 * jax.random.normal(ks[0], (1, C)),
        "ln1_b": 0.01 * jax.random.normal(ks[1], (1, C)),
        "w_attn": std * jax.random.normal(ks[2], (3 * C, C)),
        "b_attn": 0.01 * jax.random.normal(ks[3], (1, 3 * C)),
        "w_proj": std * jax.random.normal(ks[4], (C, C)),
        "b_proj": 0.01 * jax.random.normal(ks[5], (1, C)),
        "ln2_g": 1.0 + 0.01 * jax.random.normal(ks[6], (1, C)),
        "ln2_b": 0.01 * jax.random.normal(ks[7], (1, C)),
        "w_fc": std * jax.random.normal(ks[8], (4 * C, C)),
        "b_fc": 0.01 * jax.random.normal(ks[9], (1, 4 * C)),
        "w_fcp": std * jax.random.normal(ks[10], (C, 4 * C)),
        "b_fcp": 0.01 * jax.random.normal(ks[11], (1, C)),
    }
    return {k: v.astype(jnp.float32) for k, v in p.items()}


if __name__ == "__main__":
    # --- small config consistent with the module ---------------------------
    B, T, C, n_head = 2, 8, 32, 4
    key = jax.random.PRNGKey(0)
    kx, kp = jax.random.split(key)
    x = jax.random.normal(kx, (B, T, C), dtype=jnp.float32)
    params = init_params(kp, C)
    prepared = prepare_block_params(params, n_head)      # host relayout, once

    out = jax.block_until_ready(block_forward(x, prepared, n_head))
    ref = jax.block_until_ready(block_reference(x, params, n_head))
    # bf16 MXU operands + approx reciprocal -> loosened tolerance vs f32 ref.
    np.testing.assert_allclose(np.asarray(out), np.asarray(ref),
                               rtol=2e-2, atol=2e-2)

    # --- hardware-aligned config: lane-dense output, multi-group attention,
    #     multi-chunk MLP loop paths actually exercised ----------------------
    B2, T2, C2, n_head2 = 2, 128, 512, 8
    kx2, kp2 = jax.random.split(jax.random.PRNGKey(1))
    x2 = jax.random.normal(kx2, (B2, T2, C2), dtype=jnp.float32)
    params2 = init_params(kp2, C2)
    prepared2 = prepare_block_params(params2, n_head2)

    out2 = jax.block_until_ready(block_forward(x2, prepared2, n_head2))
    ref2 = jax.block_until_ready(block_reference(x2, params2, n_head2))
    np.testing.assert_allclose(np.asarray(out2), np.asarray(ref2),
                               rtol=3e-2, atol=3e-2)

    print("KERNEL_OK")
</pallas_src>

<mosaic_0001>
module attributes {stable_mosaic.version = 11 : i64} {
  func.func @kernel(%arg0: i32, %arg1: memref<1x8x32xf32, #tpu.memory_space<vmem>>, %arg2: memref<1x32xf32, #tpu.memory_space<vmem>>, %arg3: memref<1x32xf32, #tpu.memory_space<vmem>>, %arg4: memref<1x32x32xbf16, #tpu.memory_space<vmem>>, %arg5: memref<1x32x32xbf16, #tpu.memory_space<vmem>>, %arg6: memref<1x32x32xbf16, #tpu.memory_space<vmem>>, %arg7: memref<1x1x32xf32, #tpu.memory_space<vmem>>, %arg8: memref<1x1x32xf32, #tpu.memory_space<vmem>>, %arg9: memref<1x1x32xf32, #tpu.memory_space<vmem>>, %arg10: memref<1x32x32xbf16, #tpu.memory_space<vmem>>, %arg11: memref<1x32xf32, #tpu.memory_space<vmem>>, %arg12: memref<1x32xf32, #tpu.memory_space<vmem>>, %arg13: memref<1x32xf32, #tpu.memory_space<vmem>>, %arg14: memref<32x128xbf16, #tpu.memory_space<vmem>>, %arg15: memref<1x128xf32, #tpu.memory_space<vmem>>, %arg16: memref<128x32xbf16, #tpu.memory_space<vmem>>, %arg17: memref<1x32xf32, #tpu.memory_space<vmem>>, %arg18: memref<1x8x32xf32, #tpu.memory_space<vmem>>, %arg19: memref<8x32xf32, #tpu.memory_space<vmem>>) attributes {dimension_semantics = [#tpu.dimension_semantics<parallel>], iteration_bounds = array<i64: 2>, scalar_prefetch = 0 : i64, scratch_operands = 1 : i64, tpu.core_type = #tpu.core_type<tc>, window_params = [{transform_indices = @transform_0, window_bounds = array<i64: 1, 8, 32>}, {pipeline_mode = #tpu.pipeline_mode<synchronous>, transform_indices = @transform_1, window_bounds = array<i64: 1, 32>}, {pipeline_mode = #tpu.pipeline_mode<synchronous>, transform_indices = @transform_2, window_bounds = array<i64: 1, 32>}, {pipeline_mode = #tpu.pipeline_mode<synchronous>, transform_indices = @transform_3, window_bounds = array<i64: 1, 32, 32>}, {pipeline_mode = #tpu.pipeline_mode<synchronous>, transform_indices = @transform_4, window_bounds = array<i64: 1, 32, 32>}, {pipeline_mode = #tpu.pipeline_mode<synchronous>, transform_indices = @transform_5, window_bounds = array<i64: 1, 32, 32>}, {pipeline_mode = #tpu.pipeline_mode<synchronous>, transform_indices = @transform_6, window_bounds = array<i64: 1, 1, 32>}, {pipeline_mode = #tpu.pipeline_mode<synchronous>, transform_indices = @transform_7, window_bounds = array<i64: 1, 1, 32>}, {pipeline_mode = #tpu.pipeline_mode<synchronous>, transform_indices = @transform_8, window_bounds = array<i64: 1, 1, 32>}, {pipeline_mode = #tpu.pipeline_mode<synchronous>, transform_indices = @transform_9, window_bounds = array<i64: 1, 32, 32>}, {pipeline_mode = #tpu.pipeline_mode<synchronous>, transform_indices = @transform_10, window_bounds = array<i64: 1, 32>}, {pipeline_mode = #tpu.pipeline_mode<synchronous>, transform_indices = @transform_11, window_bounds = array<i64: 1, 32>}, {pipeline_mode = #tpu.pipeline_mode<synchronous>, transform_indices = @transform_12, window_bounds = array<i64: 1, 32>}, {pipeline_mode = #tpu.pipeline_mode<synchronous>, transform_indices = @transform_13, window_bounds = array<i64: 32, 128>}, {pipeline_mode = #tpu.pipeline_mode<synchronous>, transform_indices = @transform_14, window_bounds = array<i64: 1, 128>}, {pipeline_mode = #tpu.pipeline_mode<synchronous>, transform_indices = @transform_15, window_bounds = array<i64: 128, 32>}, {pipeline_mode = #tpu.pipeline_mode<synchronous>, transform_indices = @transform_16, window_bounds = array<i64: 1, 32>}, {transform_indices = @transform_17, window_bounds = array<i64: 1, 8, 32>}]} {
    %c0 = arith.constant 0 : index
    %c0_0 = arith.constant 0 : index
    %c0_1 = arith.constant 0 : index
    %0 = vector.load %arg1[%c0, %c0_0, %c0_1] : memref<1x8x32xf32, #tpu.memory_space<vmem>>, vector<1x8x32xf32>
    %1 = vector.shape_cast %0 : vector<1x8x32xf32> to vector<8x32xf32>
    %c0_2 = arith.constant 0 : index
    %c0_3 = arith.constant 0 : index
    %2 = vector.load %arg2[%c0_2, %c0_3] : memref<1x32xf32, #tpu.memory_space<vmem>>, vector<1x32xf32>
    %c0_4 = arith.constant 0 : index
    %c0_5 = arith.constant 0 : index
    %3 = vector.load %arg3[%c0_4, %c0_5] : memref<1x32xf32, #tpu.memory_space<vmem>>, vector<1x32xf32>
    %cst = arith.constant dense<0.000000e+00> : vector<8xf32>
    %4 = vector.multi_reduction <add>, %1, %cst [1] : vector<8x32xf32> to vector<8xf32>
    %5 = vector.shape_cast %4 : vector<8xf32> to vector<8x1xf32>
    %cst_6 = arith.constant 3.200000e+01 : f32
    %6 = vector.broadcast %cst_6 : f32 to vector<8x1xf32>
    %7 = arith.divf %5, %6 : vector<8x1xf32>
    %8 = arith.mulf %1, %1 : vector<8x32xf32>
    %cst_7 = arith.constant dense<0.000000e+00> : vector<8xf32>
    %9 = vector.multi_reduction <add>, %8, %cst_7 [1] : vector<8x32xf32> to vector<8xf32>
    %10 = vector.shape_cast %9 : vector<8xf32> to vector<8x1xf32>
    %cst_8 = arith.constant 3.200000e+01 : f32
    %11 = vector.broadcast %cst_8 : f32 to vector<8x1xf32>
    %12 = arith.divf %10, %11 : vector<8x1xf32>
    %13 = arith.mulf %7, %7 : vector<8x1xf32>
    %14 = arith.subf %12, %13 : vector<8x1xf32>
    %15 = vector.broadcast %7 : vector<8x1xf32> to vector<8x32xf32>
    %16 = arith.subf %1, %15 : vector<8x32xf32>
    %cst_9 = arith.constant 9.99999974E-6 : f32
    %17 = vector.broadcast %cst_9 : f32 to vector<8x1xf32>
    %18 = arith.addf %14, %17 : vector<8x1xf32>
    %19 = math.rsqrt %18 : vector<8x1xf32>
    %20 = vector.broadcast %19 : vector<8x1xf32> to vector<8x32xf32>
    %21 = arith.mulf %16, %20 : vector<8x32xf32>
    %22 = vector.broadcast %2 : vector<1x32xf32> to vector<8x32xf32>
    %23 = arith.mulf %21, %22 : vector<8x32xf32>
    %24 = vector.broadcast %3 : vector<1x32xf32> to vector<8x32xf32>
    %25 = arith.addf %23, %24 : vector<8x32xf32>
    %26 = arith.truncf %25 : vector<8x32xf32> to vector<8x32xbf16>
    %27 = tpu.iota {dimensions = array<i32: 0>} : vector<8x8xi32>
    %28 = tpu.iota {dimensions = array<i32: 1>} : vector<8x8xi32>
    %29 = arith.cmpi sle, %28, %27 : vector<8x8xi32>
    %cst_10 = arith.constant 0.000000e+00 : f32
    %30 = vector.broadcast %cst_10 : f32 to vector<8x32xf32>
    %c0_11 = arith.constant 0 : index
    %c0_12 = arith.constant 0 : index
    %31 = vector.load %arg19[%c0_11, %c0_12] : memref<8x32xf32, #tpu.memory_space<vmem>>, vector<8x32xf32>
    tpu.vector_store %arg19[%c0_11, %c0_12], %30 {strides = array<i32>} : memref<8x32xf32, #tpu.memory_space<vmem>>, vector<8x32xf32>,
    %c0_i32 = arith.constant 0 : i32
    %32 = arith.index_cast %c0_i32 : i32 to index
    %c0_13 = arith.constant 0 : index
    %c0_14 = arith.constant 0 : index
    %33 = vector.load %arg4[%32, %c0_13, %c0_14] : memref<1x32x32xbf16, #tpu.memory_space<vmem>>, vector<1x32x32xbf16>
    %34 = vector.shape_cast %33 : vector<1x32x32xbf16> to vector<32x32xbf16>
    %cst_15 = arith.constant dense<0.000000e+00> : vector<8x32xf32>
    %35 = tpu.matmul %26, %34, %cst_15 {dimension_numbers = #tpu.dot_dimension_numbers<[1], [0], [0], [1], [0, 0, 1, 1], [], []>} : vector<8x32xbf16>, vector<32x32xbf16>, vector<8x32xf32> -> vector<8x32xf32>
    %36 = arith.index_cast %c0_i32 : i32 to index
    %c0_16 = arith.constant 0 : index
    %c0_17 = arith.constant 0 : index
    %37 = vector.load %arg7[%36, %c0_16, %c0_17] : memref<1x1x32xf32, #tpu.memory_space<vmem>>, vector<1x1x32xf32>
    %38 = vector.shape_cast %37 : vector<1x1x32xf32> to vector<1x32xf32>
    %39 = vector.broadcast %38 : vector<1x32xf32> to vector<8x32xf32>
    %40 = arith.addf %35, %39 : vector<8x32xf32>
    %41 = arith.truncf %40 : vector<8x32xf32> to vector<8x32xbf16>
    %42 = arith.index_cast %c0_i32 : i32 to index
    %c0_18 = arith.constant 0 : index
    %c0_19 = arith.constant 0 : index
    %43 = vector.load %arg5[%42, %c0_18, %c0_19] : memref<1x32x32xbf16, #tpu.memory_space<vmem>>, vector<1x32x32xbf16>
    %44 = vector.shape_cast %43 : vector<1x32x32xbf16> to vector<32x32xbf16>
    %cst_20 = arith.constant dense<0.000000e+00> : vector<8x32xf32>
    %45 = tpu.matmul %26, %44, %cst_20 {dimension_numbers = #tpu.dot_dimension_numbers<[1], [0], [0], [1], [0, 0, 1, 1], [], []>} : vector<8x32xbf16>, vector<32x32xbf16>, vector<8x32xf32> -> vector<8x32xf32>
    %46 = arith.index_cast %c0_i32 : i32 to index
    %c0_21 = arith.constant 0 : index
    %c0_22 = arith.constant 0 : index
    %47 = vector.load %arg8[%46, %c0_21, %c0_22] : memref<1x1x32xf32, #tpu.memory_space<vmem>>, vector<1x1x32xf32>
    %48 = vector.shape_cast %47 : vector<1x1x32xf32> to vector<1x32xf32>
    %49 = vector.broadcast %48 : vector<1x32xf32> to vector<8x32xf32>
    %50 = arith.addf %45, %49 : vector<8x32xf32>
    %51 = arith.truncf %50 : vector<8x32xf32> to vector<8x32xbf16>
    %52 = arith.index_cast %c0_i32 : i32 to index
    %c0_23 = arith.constant 0 : index
    %c0_24 = arith.constant 0 : index
    %53 = vector.load %arg6[%52, %c0_23, %c0_24] : memref<1x32x32xbf16, #tpu.memory_space<vmem>>, vector<1x32x32xbf16>
    %54 = vector.shape_cast %53 : vector<1x32x32xbf16> to vector<32x32xbf16>
    %cst_25 = arith.constant dense<0.000000e+00> : vector<8x32xf32>
    %55 = tpu.matmul %26, %54, %cst_25 {dimension_numbers = #tpu.dot_dimension_numbers<[1], [0], [0], [1], [0, 0, 1, 1], [], []>} : vector<8x32xbf16>, vector<32x32xbf16>, vector<8x32xf32> -> vector<8x32xf32>
    %56 = arith.index_cast %c0_i32 : i32 to index
    %c0_26 = arith.constant 0 : index
    %c0_27 = arith.constant 0 : index
    %57 = vector.load %arg9[%56, %c0_26, %c0_27] : memref<1x1x32xf32, #tpu.memory_space<vmem>>, vector<1x1x32xf32>
    %58 = vector.shape_cast %57 : vector<1x1x32xf32> to vector<1x32xf32>
    %59 = vector.broadcast %58 : vector<1x32xf32> to vector<8x32xf32>
    %60 = arith.addf %55, %59 : vector<8x32xf32>
    %61 = arith.truncf %60 : vector<8x32xf32> to vector<8x32xbf16>
    %62 = vector.extract_strided_slice %41 {offsets = [0, 0], sizes = [8, 8], strides = [1, 1]} : vector<8x32xbf16> to vector<8x8xbf16>
    %63 = vector.extract_strided_slice %51 {offsets = [0, 0], sizes = [8, 8], strides = [1, 1]} : vector<8x32xbf16> to vector<8x8xbf16>
    %64 = vector.extract_strided_slice %61 {offsets = [0, 0], sizes = [8, 8], strides = [1, 1]} : vector<8x32xbf16> to vector<8x8xbf16>
    %cst_28 = arith.constant dense<0.000000e+00> : vector<8x8xf32>
    %65 = tpu.matmul %62, %63, %cst_28 {dimension_numbers = #tpu.dot_dimension_numbers<[1], [1], [0], [0], [0, 0, 1, 0], [], []>} : vector<8x8xbf16>, vector<8x8xbf16>, vector<8x8xf32> -> vector<8x8xf32>
    %cst_29 = arith.constant -1.000000e+30 : f32
    %66 = vector.broadcast %cst_29 : f32 to vector<8x8xf32>
    %67 = arith.select %29, %65, %66 : vector<8x8xi1>, vector<8x8xf32>
    %cst_30 = arith.constant dense<0xFF800000> : vector<8xf32>
    %68 = vector.multi_reduction <maximumf>, %67, %cst_30 [1] : vector<8x8xf32> to vector<8xf32>
    %69 = vector.shape_cast %68 : vector<8xf32> to vector<8x1xf32>
    %70 = vector.broadcast %69 : vector<8x1xf32> to vector<8x8xf32>
    %71 = arith.subf %67, %70 : vector<8x8xf32>
    %72 = math.exp %71 : vector<8x8xf32>
    %cst_31 = arith.constant dense<0.000000e+00> : vector<8xf32>
    %73 = vector.multi_reduction <add>, %72, %cst_31 [1] : vector<8x8xf32> to vector<8xf32>
    %74 = vector.shape_cast %73 : vector<8xf32> to vector<8x1xf32>
    %75 = tpu.reciprocal %74 {approx = true} : vector<8x1xf32> -> vector<8x1xf32>
    %76 = arith.truncf %72 : vector<8x8xf32> to vector<8x8xbf16>
    %cst_32 = arith.constant dense<0.000000e+00> : vector<8x8xf32>
    %77 = tpu.matmul %76, %64, %cst_32 {dimension_numbers = #tpu.dot_dimension_numbers<[1], [0], [0], [1], [0, 0, 1, 1], [], []>} : vector<8x8xbf16>, vector<8x8xbf16>, vector<8x8xf32> -> vector<8x8xf32>
    %78 = vector.broadcast %75 : vector<8x1xf32> to vector<8x8xf32>
    %79 = arith.mulf %77, %78 : vector<8x8xf32>
    %80 = arith.truncf %79 : vector<8x8xf32> to vector<8x8xbf16>
    %81 = vector.extract_strided_slice %41 {offsets = [0, 8], sizes = [8, 8], strides = [1, 1]} : vector<8x32xbf16> to vector<8x8xbf16>
    %82 = vector.extract_strided_slice %51 {offsets = [0, 8], sizes = [8, 8], strides = [1, 1]} : vector<8x32xbf16> to vector<8x8xbf16>
    %83 = vector.extract_strided_slice %61 {offsets = [0, 8], sizes = [8, 8], strides = [1, 1]} : vector<8x32xbf16> to vector<8x8xbf16>
    %cst_33 = arith.constant dense<0.000000e+00> : vector<8x8xf32>
    %84 = tpu.matmul %81, %82, %cst_33 {dimension_numbers = #tpu.dot_dimension_numbers<[1], [1], [0], [0], [0, 0, 1, 0], [], []>} : vector<8x8xbf16>, vector<8x8xbf16>, vector<8x8xf32> -> vector<8x8xf32>
    %cst_34 = arith.constant -1.000000e+30 : f32
    %85 = vector.broadcast %cst_34 : f32 to vector<8x8xf32>
    %86 = arith.select %29, %84, %85 : vector<8x8xi1>, vector<8x8xf32>
    %cst_35 = arith.constant dense<0xFF800000> : vector<8xf32>
    %87 = vector.multi_reduction <maximumf>, %86, %cst_35 [1] : vector<8x8xf32> to vector<8xf32>
    %88 = vector.shape_cast %87 : vector<8xf32> to vector<8x1xf32>
    %89 = vector.broadcast %88 : vector<8x1xf32> to vector<8x8xf32>
    %90 = arith.subf %86, %89 : vector<8x8xf32>
    %91 = math.exp %90 : vector<8x8xf32>
    %cst_36 = arith.constant dense<0.000000e+00> : vector<8xf32>
    %92 = vector.multi_reduction <add>, %91, %cst_36 [1] : vector<8x8xf32> to vector<8xf32>
    %93 = vector.shape_cast %92 : vector<8xf32> to vector<8x1xf32>
    %94 = tpu.reciprocal %93 {approx = true} : vector<8x1xf32> -> vector<8x1xf32>
    %95 = arith.truncf %91 : vector<8x8xf32> to vector<8x8xbf16>
    %cst_37 = arith.constant dense<0.000000e+00> : vector<8x8xf32>
    %96 = tpu.matmul %95, %83, %cst_37 {dimension_numbers = #tpu.dot_dimension_numbers<[1], [0], [0], [1], [0, 0, 1, 1], [], []>} : vector<8x8xbf16>, vector<8x8xbf16>, vector<8x8xf32> -> vector<8x8xf32>
    %97 = vector.broadcast %94 : vector<8x1xf32> to vector<8x8xf32>
    %98 = arith.mulf %96, %97 : vector<8x8xf32>
    %99 = arith.truncf %98 : vector<8x8xf32> to vector<8x8xbf16>
    %100 = vector.extract_strided_slice %41 {offsets = [0, 16], sizes = [8, 8], strides = [1, 1]} : vector<8x32xbf16> to vector<8x8xbf16>
    %101 = vector.extract_strided_slice %51 {offsets = [0, 16], sizes = [8, 8], strides = [1, 1]} : vector<8x32xbf16> to vector<8x8xbf16>
    %102 = vector.extract_strided_slice %61 {offsets = [0, 16], sizes = [8, 8], strides = [1, 1]} : vector<8x32xbf16> to vector<8x8xbf16>
    %cst_38 = arith.constant dense<0.000000e+00> : vector<8x8xf32>
    %103 = tpu.matmul %100, %101, %cst_38 {dimension_numbers = #tpu.dot_dimension_numbers<[1], [1], [0], [0], [0, 0, 1, 0], [], []>} : vector<8x8xbf16>, vector<8x8xbf16>, vector<8x8xf32> -> vector<8x8xf32>
    %cst_39 = arith.constant -1.000000e+30 : f32
    %104 = vector.broadcast %cst_39 : f32 to vector<8x8xf32>
    %105 = arith.select %29, %103, %104 : vector<8x8xi1>, vector<8x8xf32>
    %cst_40 = arith.constant dense<0xFF800000> : vector<8xf32>
    %106 = vector.multi_reduction <maximumf>, %105, %cst_40 [1] : vector<8x8xf32> to vector<8xf32>
    %107 = vector.shape_cast %106 : vector<8xf32> to vector<8x1xf32>
    %108 = vector.broadcast %107 : vector<8x1xf32> to vector<8x8xf32>
    %109 = arith.subf %105, %108 : vector<8x8xf32>
    %110 = math.exp %109 : vector<8x8xf32>
    %cst_41 = arith.constant dense<0.000000e+00> : vector<8xf32>
    %111 = vector.multi_reduction <add>, %110, %cst_41 [1] : vector<8x8xf32> to vector<8xf32>
    %112 = vector.shape_cast %111 : vector<8xf32> to vector<8x1xf32>
    %113 = tpu.reciprocal %112 {approx = true} : vector<8x1xf32> -> vector<8x1xf32>
    %114 = arith.truncf %110 : vector<8x8xf32> to vector<8x8xbf16>
    %cst_42 = arith.constant dense<0.000000e+00> : vector<8x8xf32>
    %115 = tpu.matmul %114, %102, %cst_42 {dimension_numbers = #tpu.dot_dimension_numbers<[1], [0], [0], [1], [0, 0, 1, 1], [], []>} : vector<8x8xbf16>, vector<8x8xbf16>, vector<8x8xf32> -> vector<8x8xf32>
    %116 = vector.broadcast %113 : vector<8x1xf32> to vector<8x8xf32>
    %117 = arith.mulf %115, %116 : vector<8x8xf32>
    %118 = arith.truncf %117 : vector<8x8xf32> to vector<8x8xbf16>
    %119 = vector.extract_strided_slice %41 {offsets = [0, 24], sizes = [8, 8], strides = [1, 1]} : vector<8x32xbf16> to vector<8x8xbf16>
    %120 = vector.extract_strided_slice %51 {offsets = [0, 24], sizes = [8, 8], strides = [1, 1]} : vector<8x32xbf16> to vector<8x8xbf16>
    %121 = vector.extract_strided_slice %61 {offsets = [0, 24], sizes = [8, 8], strides = [1, 1]} : vector<8x32xbf16> to vector<8x8xbf16>
    %cst_43 = arith.constant dense<0.000000e+00> : vector<8x8xf32>
    %122 = tpu.matmul %119, %120, %cst_43 {dimension_numbers = #tpu.dot_dimension_numbers<[1], [1], [0], [0], [0, 0, 1, 0], [], []>} : vector<8x8xbf16>, vector<8x8xbf16>, vector<8x8xf32> -> vector<8x8xf32>
    %cst_44 = arith.constant -1.000000e+30 : f32
    %123 = vector.broadcast %cst_44 : f32 to vector<8x8xf32>
    %124 = arith.select %29, %122, %123 : vector<8x8xi1>, vector<8x8xf32>
    %cst_45 = arith.constant dense<0xFF800000> : vector<8xf32>
    %125 = vector.multi_reduction <maximumf>, %124, %cst_45 [1] : vector<8x8xf32> to vector<8xf32>
    %126 = vector.shape_cast %125 : vector<8xf32> to vector<8x1xf32>
    %127 = vector.broadcast %126 : vector<8x1xf32> to vector<8x8xf32>
    %128 = arith.subf %124, %127 : vector<8x8xf32>
    %129 = math.exp %128 : vector<8x8xf32>
    %cst_46 = arith.constant dense<0.000000e+00> : vector<8xf32>
    %130 = vector.multi_reduction <add>, %129, %cst_46 [1] : vector<8x8xf32> to vector<8xf32>
    %131 = vector.shape_cast %130 : vector<8xf32> to vector<8x1xf32>
    %132 = tpu.reciprocal %131 {approx = true} : vector<8x1xf32> -> vector<8x1xf32>
    %133 = arith.truncf %129 : vector<8x8xf32> to vector<8x8xbf16>
    %cst_47 = arith.constant dense<0.000000e+00> : vector<8x8xf32>
    %134 = tpu.matmul %133, %121, %cst_47 {dimension_numbers = #tpu.dot_dimension_numbers<[1], [0], [0], [1], [0, 0, 1, 1], [], []>} : vector<8x8xbf16>, vector<8x8xbf16>, vector<8x8xf32> -> vector<8x8xf32>
    %135 = vector.broadcast %132 : vector<8x1xf32> to vector<8x8xf32>
    %136 = arith.mulf %134, %135 : vector<8x8xf32>
    %137 = arith.truncf %136 : vector<8x8xf32> to vector<8x8xbf16>
    %138 = tpu.concatenate %80, %99, %118, %137 in 1 : vector<8x8xbf16>, vector<8x8xbf16>, vector<8x8xbf16>, vector<8x8xbf16> -> vector<8x32xbf16>
    %c0_48 = arith.constant 0 : index
    %c0_49 = arith.constant 0 : index
    %139 = vector.load %arg19[%c0_48, %c0_49] : memref<8x32xf32, #tpu.memory_space<vmem>>, vector<8x32xf32>
    %140 = arith.index_cast %c0_i32 : i32 to index
    %c0_50 = arith.constant 0 : index
    %c0_51 = arith.constant 0 : index
    %141 = vector.load %arg10[%140, %c0_50, %c0_51] : memref<1x32x32xbf16, #tpu.memory_space<vmem>>, vector<1x32x32xbf16>
    %142 = vector.shape_cast %141 : vector<1x32x32xbf16> to vector<32x32xbf16>
    %cst_52 = arith.constant dense<0.000000e+00> : vector<8x32xf32>
    %143 = tpu.matmul %138, %142, %cst_52 {dimension_numbers = #tpu.dot_dimension_numbers<[1], [0], [0], [1], [0, 0, 1, 1], [], []>} : vector<8x32xbf16>, vector<32x32xbf16>, vector<8x32xf32> -> vector<8x32xf32>
    %144 = arith.addf %139, %143 : vector<8x32xf32>
    %c0_53 = arith.constant 0 : index
    %c0_54 = arith.constant 0 : index
    %145 = vector.load %arg19[%c0_53, %c0_54] : memref<8x32xf32, #tpu.memory_space<vmem>>, vector<8x32xf32>
    tpu.vector_store %arg19[%c0_53, %c0_54], %144 {strides = array<i32>} : memref<8x32xf32, #tpu.memory_space<vmem>>, vector<8x32xf32>,
    %c1_i32 = arith.constant 1 : i32
    %c0_55 = arith.constant 0 : index
    %c0_56 = arith.constant 0 : index
    %146 = vector.load %arg19[%c0_55, %c0_56] : memref<8x32xf32, #tpu.memory_space<vmem>>, vector<8x32xf32>
    %147 = arith.addf %1, %146 : vector<8x32xf32>
    %c0_57 = arith.constant 0 : index
    %c0_58 = arith.constant 0 : index
    %148 = vector.load %arg11[%c0_57, %c0_58] : memref<1x32xf32, #tpu.memory_space<vmem>>, vector<1x32xf32>
    %149 = vector.broadcast %148 : vector<1x32xf32> to vector<8x32xf32>
    %150 = arith.addf %147, %149 : vector<8x32xf32>
    %c0_59 = arith.constant 0 : index
    %c0_60 = arith.constant 0 : index
    %151 = vector.load %arg12[%c0_59, %c0_60] : memref<1x32xf32, #tpu.memory_space<vmem>>, vector<1x32xf32>
    %c0_61 = arith.constant 0 : index
    %c0_62 = arith.constant 0 : index
    %152 = vector.load %arg13[%c0_61, %c0_62] : memref<1x32xf32, #tpu.memory_space<vmem>>, vector<1x32xf32>
    %cst_63 = arith.constant dense<0.000000e+00> : vector<8xf32>
    %153 = vector.multi_reduction <add>, %150, %cst_63 [1] : vector<8x32xf32> to vector<8xf32>
    %154 = vector.shape_cast %153 : vector<8xf32> to vector<8x1xf32>
    %cst_64 = arith.constant 3.200000e+01 : f32
    %155 = vector.broadcast %cst_64 : f32 to vector<8x1xf32>
    %156 = arith.divf %154, %155 : vector<8x1xf32>
    %157 = arith.mulf %150, %150 : vector<8x32xf32>
    %cst_65 = arith.constant dense<0.000000e+00> : vector<8xf32>
    %158 = vector.multi_reduction <add>, %157, %cst_65 [1] : vector<8x32xf32> to vector<8xf32>
    %159 = vector.shape_cast %158 : vector<8xf32> to vector<8x1xf32>
    %cst_66 = arith.constant 3.200000e+01 : f32
    %160 = vector.broadcast %cst_66 : f32 to vector<8x1xf32>
    %161 = arith.divf %159, %160 : vector<8x1xf32>
    %162 = arith.mulf %156, %156 : vector<8x1xf32>
    %163 = arith.subf %161, %162 : vector<8x1xf32>
    %164 = vector.broadcast %156 : vector<8x1xf32> to vector<8x32xf32>
    %165 = arith.subf %150, %164 : vector<8x32xf32>
    %cst_67 = arith.constant 9.99999974E-6 : f32
    %166 = vector.broadcast %cst_67 : f32 to vector<8x1xf32>
    %167 = arith.addf %163, %166 : vector<8x1xf32>
    %168 = math.rsqrt %167 : vector<8x1xf32>
    %169 = vector.broadcast %168 : vector<8x1xf32> to vector<8x32xf32>
    %170 = arith.mulf %165, %169 : vector<8x32xf32>
    %171 = vector.broadcast %151 : vector<1x32xf32> to vector<8x32xf32>
    %172 = arith.mulf %170, %171 : vector<8x32xf32>
    %173 = vector.broadcast %152 : vector<1x32xf32> to vector<8x32xf32>
    %174 = arith.addf %172, %173 : vector<8x32xf32>
    %175 = arith.truncf %174 : vector<8x32xf32> to vector<8x32xbf16>
    %cst_68 = arith.constant 0.000000e+00 : f32
    %176 = vector.broadcast %cst_68 : f32 to vector<8x32xf32>
    %c0_69 = arith.constant 0 : index
    %c0_70 = arith.constant 0 : index
    %177 = vector.load %arg19[%c0_69, %c0_70] : memref<8x32xf32, #tpu.memory_space<vmem>>, vector<8x32xf32>
    tpu.vector_store %arg19[%c0_69, %c0_70], %176 {strides = array<i32>} : memref<8x32xf32, #tpu.memory_space<vmem>>, vector<8x32xf32>,
    %c0_71 = arith.constant 0 : index
    %c0_72 = arith.constant 0 : index
    %178 = vector.load %arg14[%c0_71, %c0_72] : memref<32x128xbf16, #tpu.memory_space<vmem>>, vector<32x128xbf16>
    %cst_73 = arith.constant dense<0.000000e+00> : vector<8x128xf32>
    %179 = tpu.matmul %175, %178, %cst_73 {dimension_numbers = #tpu.dot_dimension_numbers<[1], [0], [0], [1], [0, 0, 1, 1], [], []>} : vector<8x32xbf16>, vector<32x128xbf16>, vector<8x128xf32> -> vector<8x128xf32>
    %c0_74 = arith.constant 0 : index
    %c0_75 = arith.constant 0 : index
    %180 = vector.load %arg15[%c0_74, %c0_75] : memref<1x128xf32, #tpu.memory_space<vmem>>, vector<1x128xf32>
    %181 = vector.broadcast %180 : vector<1x128xf32> to vector<8x128xf32>
    %182 = arith.addf %179, %181 : vector<8x128xf32>
    %cst_76 = arith.constant 5.000000e-01 : f32
    %183 = vector.broadcast %cst_76 : f32 to vector<8x128xf32>
    %184 = arith.mulf %183, %182 : vector<8x128xf32>
    %cst_77 = arith.constant 4.471500e-02 : f32
    %185 = vector.broadcast %cst_77 : f32 to vector<8x128xf32>
    %186 = arith.mulf %185, %182 : vector<8x128xf32>
    %187 = arith.mulf %186, %182 : vector<8x128xf32>
    %188 = arith.mulf %187, %182 : vector<8x128xf32>
    %189 = arith.addf %182, %188 : vector<8x128xf32>
    %cst_78 = arith.constant 0.797884583 : f32
    %190 = vector.broadcast %cst_78 : f32 to vector<8x128xf32>
    %191 = arith.mulf %190, %189 : vector<8x128xf32>
    %192 = math.tanh %191 : vector<8x128xf32>
    %cst_79 = arith.constant 1.000000e+00 : f32
    %193 = vector.broadcast %cst_79 : f32 to vector<8x128xf32>
    %194 = arith.addf %193, %192 : vector<8x128xf32>
    %195 = arith.mulf %184, %194 : vector<8x128xf32>
    %c0_80 = arith.constant 0 : index
    %c0_81 = arith.constant 0 : index
    %196 = vector.load %arg19[%c0_80, %c0_81] : memref<8x32xf32, #tpu.memory_space<vmem>>, vector<8x32xf32>
    %197 = arith.truncf %195 : vector<8x128xf32> to vector<8x128xbf16>
    %c0_82 = arith.constant 0 : index
    %c0_83 = arith.constant 0 : index
    %198 = vector.load %arg16[%c0_82, %c0_83] : memref<128x32xbf16, #tpu.memory_space<vmem>>, vector<128x32xbf16>
    %cst_84 = arith.constant dense<0.000000e+00> : vector<8x32xf32>
    %199 = tpu.matmul %197, %198, %cst_84 {dimension_numbers = #tpu.dot_dimension_numbers<[1], [0], [0], [1], [0, 0, 1, 1], [], []>} : vector<8x128xbf16>, vector<128x32xbf16>, vector<8x32xf32> -> vector<8x32xf32>
    %200 = arith.addf %196, %199 : vector<8x32xf32>
    %c0_85 = arith.constant 0 : index
    %c0_86 = arith.constant 0 : index
    %201 = vector.load %arg19[%c0_85, %c0_86] : memref<8x32xf32, #tpu.memory_space<vmem>>, vector<8x32xf32>
    tpu.vector_store %arg19[%c0_85, %c0_86], %200 {strides = array<i32>} : memref<8x32xf32, #tpu.memory_space<vmem>>, vector<8x32xf32>,
    %c0_87 = arith.constant 0 : index
    %c0_88 = arith.constant 0 : index
    %202 = vector.load %arg19[%c0_87, %c0_88] : memref<8x32xf32, #tpu.memory_space<vmem>>, vector<8x32xf32>
    %203 = arith.addf %150, %202 : vector<8x32xf32>
    %c0_89 = arith.constant 0 : index
    %c0_90 = arith.constant 0 : index
    %204 = vector.load %arg17[%c0_89, %c0_90] : memref<1x32xf32, #tpu.memory_space<vmem>>, vector<1x32xf32>
    %205 = vector.broadcast %204 : vector<1x32xf32> to vector<8x32xf32>
    %206 = arith.addf %203, %205 : vector<8x32xf32>
    %c0_91 = arith.constant 0 : index
    %c0_92 = arith.constant 0 : index
    %c0_93 = arith.constant 0 : index
    %207 = vector.load %arg18[%c0_91, %c0_92, %c0_93] : memref<1x8x32xf32, #tpu.memory_space<vmem>>, vector<1x8x32xf32>
    %208 = vector.shape_cast %207 : vector<1x8x32xf32> to vector<8x32xf32>
    %209 = vector.shape_cast %206 : vector<8x32xf32> to vector<1x8x32xf32>
    tpu.vector_store %arg18[%c0_91, %c0_92, %c0_93], %209 {strides = array<i32>} : memref<1x8x32xf32, #tpu.memory_space<vmem>>, vector<1x8x32xf32>,
    return
  }
  func.func @transform_0(%arg0: i32) -> (i32, i32, i32) {
    %c0_i32 = arith.constant 0 : i32
    %c0_i32_0 = arith.constant 0 : i32
    %c0_i32_1 = arith.constant 0 : i32
    return %arg0, %c0_i32, %c0_i32_0 : i32, i32, i32
  }
  func.func @transform_1(%arg0: i32) -> (i32, i32) {
    %c0_i32 = arith.constant 0 : i32
    %c0_i32_0 = arith.constant 0 : i32
    %c0_i32_1 = arith.constant 0 : i32
    return %c0_i32, %c0_i32_0 : i32, i32
  }
  func.func @transform_2(%arg0: i32) -> (i32, i32) {
    %c0_i32 = arith.constant 0 : i32
    %c0_i32_0 = arith.constant 0 : i32
    %c0_i32_1 = arith.constant 0 : i32
    return %c0_i32, %c0_i32_0 : i32, i32
  }
  func.func @transform_3(%arg0: i32) -> (i32, i32, i32) {
    %c0_i32 = arith.constant 0 : i32
    %c0_i32_0 = arith.constant 0 : i32
    %c0_i32_1 = arith.constant 0 : i32
    %c0_i32_2 = arith.constant 0 : i32
    return %c0_i32, %c0_i32_0, %c0_i32_1 : i32, i32, i32
  }
  func.func @transform_4(%arg0: i32) -> (i32, i32, i32) {
    %c0_i32 = arith.constant 0 : i32
    %c0_i32_0 = arith.constant 0 : i32
    %c0_i32_1 = arith.constant 0 : i32
    %c0_i32_2 = arith.constant 0 : i32
    return %c0_i32, %c0_i32_0, %c0_i32_1 : i32, i32, i32
  }
  func.func @transform_5(%arg0: i32) -> (i32, i32, i32) {
    %c0_i32 = arith.constant 0 : i32
    %c0_i32_0 = arith.constant 0 : i32
    %c0_i32_1 = arith.constant 0 : i32
    %c0_i32_2 = arith.constant 0 : i32
    return %c0_i32, %c0_i32_0, %c0_i32_1 : i32, i32, i32
  }
  func.func @transform_6(%arg0: i32) -> (i32, i32, i32) {
    %c0_i32 = arith.constant 0 : i32
    %c0_i32_0 = arith.constant 0 : i32
    %c0_i32_1 = arith.constant 0 : i32
    %c0_i32_2 = arith.constant 0 : i32
    return %c0_i32, %c0_i32_0, %c0_i32_1 : i32, i32, i32
  }
  func.func @transform_7(%arg0: i32) -> (i32, i32, i32) {
    %c0_i32 = arith.constant 0 : i32
    %c0_i32_0 = arith.constant 0 : i32
    %c0_i32_1 = arith.constant 0 : i32
    %c0_i32_2 = arith.constant 0 : i32
    return %c0_i32, %c0_i32_0, %c0_i32_1 : i32, i32, i32
  }
  func.func @transform_8(%arg0: i32) -> (i32, i32, i32) {
    %c0_i32 = arith.constant 0 : i32
    %c0_i32_0 = arith.constant 0 : i32
    %c0_i32_1 = arith.constant 0 : i32
    %c0_i32_2 = arith.constant 0 : i32
    return %c0_i32, %c0_i32_0, %c0_i32_1 : i32, i32, i32
  }
  func.func @transform_9(%arg0: i32) -> (i32, i32, i32) {
    %c0_i32 = arith.constant 0 : i32
    %c0_i32_0 = arith.constant 0 : i32
    %c0_i32_1 = arith.constant 0 : i32
    %c0_i32_2 = arith.constant 0 : i32
    return %c0_i32, %c0_i32_0, %c0_i32_1 : i32, i32, i32
  }
  func.func @transform_10(%arg0: i32) -> (i32, i32) {
    %c0_i32 = arith.constant 0 : i32
    %c0_i32_0 = arith.constant 0 : i32
    %c0_i32_1 = arith.constant 0 : i32
    return %c0_i32, %c0_i32_0 : i32, i32
  }
  func.func @transform_11(%arg0: i32) -> (i32, i32) {
    %c0_i32 = arith.constant 0 : i32
    %c0_i32_0 = arith.constant 0 : i32
    %c0_i32_1 = arith.constant 0 : i32
    return %c0_i32, %c0_i32_0 : i32, i32
  }
  func.func @transform_12(%arg0: i32) -> (i32, i32) {
    %c0_i32 = arith.constant 0 : i32
    %c0_i32_0 = arith.constant 0 : i32
    %c0_i32_1 = arith.constant 0 : i32
    return %c0_i32, %c0_i32_0 : i32, i32
  }
  func.func @transform_13(%arg0: i32) -> (i32, i32) {
    %c0_i32 = arith.constant 0 : i32
    %c0_i32_0 = arith.constant 0 : i32
    %c0_i32_1 = arith.constant 0 : i32
    return %c0_i32, %c0_i32_0 : i32, i32
  }
  func.func @transform_14(%arg0: i32) -> (i32, i32) {
    %c0_i32 = arith.constant 0 : i32
    %c0_i32_0 = arith.constant 0 : i32
    %c0_i32_1 = arith.constant 0 : i32
    return %c0_i32, %c0_i32_0 : i32, i32
  }
  func.func @transform_15(%arg0: i32) -> (i32, i32) {
    %c0_i32 = arith.constant 0 : i32
    %c0_i32_0 = arith.constant 0 : i32
    %c0_i32_1 = arith.constant 0 : i32
    return %c0_i32, %c0_i32_0 : i32, i32
  }
  func.func @transform_16(%arg0: i32) -> (i32, i32) {
    %c0_i32 = arith.constant 0 : i32
    %c0_i32_0 = arith.constant 0 : i32
    %c0_i32_1 = arith.constant 0 : i32
    return %c0_i32, %c0_i32_0 : i32, i32
  }
  func.func @transform_17(%arg0: i32) -> (i32, i32, i32) {
    %c0_i32 = arith.constant 0 : i32
    %c0_i32_0 = arith.constant 0 : i32
    %c0_i32_1 = arith.constant 0 : i32
    return %arg0, %c0_i32, %c0_i32_0 : i32, i32, i32
  }
}

module attributes {stable_mosaic.version = 11 : i64} {
  func.func @kernel(%arg0: i32, %arg1: memref<1x8x32xf32, #tpu.memory_space<vmem>>, %arg2: memref<1x32xf32, #tpu.memory_space<vmem>>, %arg3: memref<1x32xf32, #tpu.memory_space<vmem>>, %arg4: memref<1x32x32xbf16, #tpu.memory_space<vmem>>, %arg5: memref<1x32x32xbf16, #tpu.memory_space<vmem>>, %arg6: memref<1x32x32xbf16, #tpu.memory_space<vmem>>, %arg7: memref<1x1x32xf32, #tpu.memory_space<vmem>>, %arg8: memref<1x1x32xf32, #tpu.memory_space<vmem>>, %arg9: memref<1x1x32xf32, #tpu.memory_space<vmem>>, %arg10: memref<1x32x32xbf16, #tpu.memory_space<vmem>>, %arg11: memref<1x32xf32, #tpu.memory_space<vmem>>, %arg12: memref<1x32xf32, #tpu.memory_space<vmem>>, %arg13: memref<1x32xf32, #tpu.memory_space<vmem>>, %arg14: memref<32x128xbf16, #tpu.memory_space<vmem>>, %arg15: memref<1x128xf32, #tpu.memory_space<vmem>>, %arg16: memref<128x32xbf16, #tpu.memory_space<vmem>>, %arg17: memref<1x32xf32, #tpu.memory_space<vmem>>, %arg18: memref<1x8x32xf32, #tpu.memory_space<vmem>>, %arg19: memref<8x32xf32, #tpu.memory_space<vmem>>) attributes {dimension_semantics = [#tpu.dimension_semantics<parallel>], iteration_bounds = array<i64: 2>, scalar_prefetch = 0 : i64, scratch_operands = 1 : i64, tpu.core_type = #tpu.core_type<tc>, window_params = [{transform_indices = @transform_0, window_bounds = array<i64: 1, 8, 32>}, {pipeline_mode = #tpu.pipeline_mode<synchronous>, transform_indices = @transform_1, window_bounds = array<i64: 1, 32>}, {pipeline_mode = #tpu.pipeline_mode<synchronous>, transform_indices = @transform_2, window_bounds = array<i64: 1, 32>}, {pipeline_mode = #tpu.pipeline_mode<synchronous>, transform_indices = @transform_3, window_bounds = array<i64: 1, 32, 32>}, {pipeline_mode = #tpu.pipeline_mode<synchronous>, transform_indices = @transform_4, window_bounds = array<i64: 1, 32, 32>}, {pipeline_mode = #tpu.pipeline_mode<synchronous>, transform_indices = @transform_5, window_bounds = array<i64: 1, 32, 32>}, {pipeline_mode = #tpu.pipeline_mode<synchronous>, transform_indices = @transform_6, window_bounds = array<i64: 1, 1, 32>}, {pipeline_mode = #tpu.pipeline_mode<synchronous>, transform_indices = @transform_7, window_bounds = array<i64: 1, 1, 32>}, {pipeline_mode = #tpu.pipeline_mode<synchronous>, transform_indices = @transform_8, window_bounds = array<i64: 1, 1, 32>}, {pipeline_mode = #tpu.pipeline_mode<synchronous>, transform_indices = @transform_9, window_bounds = array<i64: 1, 32, 32>}, {pipeline_mode = #tpu.pipeline_mode<synchronous>, transform_indices = @transform_10, window_bounds = array<i64: 1, 32>}, {pipeline_mode = #tpu.pipeline_mode<synchronous>, transform_indices = @transform_11, window_bounds = array<i64: 1, 32>}, {pipeline_mode = #tpu.pipeline_mode<synchronous>, transform_indices = @transform_12, window_bounds = array<i64: 1, 32>}, {pipeline_mode = #tpu.pipeline_mode<synchronous>, transform_indices = @transform_13, window_bounds = array<i64: 32, 128>}, {pipeline_mode = #tpu.pipeline_mode<synchronous>, transform_indices = @transform_14, window_bounds = array<i64: 1, 128>}, {pipeline_mode = #tpu.pipeline_mode<synchronous>, transform_indices = @transform_15, window_bounds = array<i64: 128, 32>}, {pipeline_mode = #tpu.pipeline_mode<synchronous>, transform_indices = @transform_16, window_bounds = array<i64: 1, 32>}, {transform_indices = @transform_17, window_bounds = array<i64: 1, 8, 32>}]} {
    %c0 = arith.constant 0 : index
    %c0_0 = arith.constant 0 : index
    %c0_1 = arith.constant 0 : index
    %0 = vector.load %arg1[%c0, %c0_0, %c0_1] : memref<1x8x32xf32, #tpu.memory_space<vmem>>, vector<1x8x32xf32>
    %1 = vector.shape_cast %0 : vector<1x8x32xf32> to vector<8x32xf32>
    %c0_2 = arith.constant 0 : index
    %c0_3 = arith.constant 0 : index
    %2 = vector.load %arg2[%c0_2, %c0_3] : memref<1x32xf32, #tpu.memory_space<vmem>>, vector<1x32xf32>
    %c0_4 = arith.constant 0 : index
    %c0_5 = arith.constant 0 : index
    %3 = vector.load %arg3[%c0_4, %c0_5] : memref<1x32xf32, #tpu.memory_space<vmem>>, vector<1x32xf32>
    %cst = arith.constant dense<0.000000e+00> : vector<8xf32>
    %4 = vector.multi_reduction <add>, %1, %cst [1] : vector<8x32xf32> to vector<8xf32>
    %5 = vector.shape_cast %4 : vector<8xf32> to vector<8x1xf32>
    %cst_6 = arith.constant 3.200000e+01 : f32
    %6 = vector.broadcast %cst_6 : f32 to vector<8x1xf32>
    %7 = arith.divf %5, %6 : vector<8x1xf32>
    %8 = arith.mulf %1, %1 : vector<8x32xf32>
    %cst_7 = arith.constant dense<0.000000e+00> : vector<8xf32>
    %9 = vector.multi_reduction <add>, %8, %cst_7 [1] : vector<8x32xf32> to vector<8xf32>
    %10 = vector.shape_cast %9 : vector<8xf32> to vector<8x1xf32>
    %cst_8 = arith.constant 3.200000e+01 : f32
    %11 = vector.broadcast %cst_8 : f32 to vector<8x1xf32>
    %12 = arith.divf %10, %11 : vector<8x1xf32>
    %13 = arith.mulf %7, %7 : vector<8x1xf32>
    %14 = arith.subf %12, %13 : vector<8x1xf32>
    %15 = vector.broadcast %7 : vector<8x1xf32> to vector<8x32xf32>
    %16 = arith.subf %1, %15 : vector<8x32xf32>
    %cst_9 = arith.constant 9.99999974E-6 : f32
    %17 = vector.broadcast %cst_9 : f32 to vector<8x1xf32>
    %18 = arith.addf %14, %17 : vector<8x1xf32>
    %19 = math.rsqrt %18 : vector<8x1xf32>
    %20 = vector.broadcast %19 : vector<8x1xf32> to vector<8x32xf32>
    %21 = arith.mulf %16, %20 : vector<8x32xf32>
    %22 = vector.broadcast %2 : vector<1x32xf32> to vector<8x32xf32>
    %23 = arith.mulf %21, %22 : vector<8x32xf32>
    %24 = vector.broadcast %3 : vector<1x32xf32> to vector<8x32xf32>
    %25 = arith.addf %23, %24 : vector<8x32xf32>
    %26 = arith.truncf %25 : vector<8x32xf32> to vector<8x32xbf16>
    %27 = tpu.iota {dimensions = array<i32: 0>} : vector<8x8xi32>
    %28 = tpu.iota {dimensions = array<i32: 1>} : vector<8x8xi32>
    %29 = arith.cmpi sle, %28, %27 : vector<8x8xi32>
    %cst_10 = arith.constant 0.000000e+00 : f32
    %30 = vector.broadcast %cst_10 : f32 to vector<8x32xf32>
    %c0_11 = arith.constant 0 : index
    %c0_12 = arith.constant 0 : index
    %31 = vector.load %arg19[%c0_11, %c0_12] : memref<8x32xf32, #tpu.memory_space<vmem>>, vector<8x32xf32>
    tpu.vector_store %arg19[%c0_11, %c0_12], %30 {strides = array<i32>} : memref<8x32xf32, #tpu.memory_space<vmem>>, vector<8x32xf32>,
    %c0_i32 = arith.constant 0 : i32
    %32 = arith.index_cast %c0_i32 : i32 to index
    %c0_13 = arith.constant 0 : index
    %c0_14 = arith.constant 0 : index
    %33 = vector.load %arg4[%32, %c0_13, %c0_14] : memref<1x32x32xbf16, #tpu.memory_space<vmem>>, vector<1x32x32xbf16>
    %34 = vector.shape_cast %33 : vector<1x32x32xbf16> to vector<32x32xbf16>
    %cst_15 = arith.constant dense<0.000000e+00> : vector<8x32xf32>
    %35 = tpu.matmul %26, %34, %cst_15 {dimension_numbers = #tpu.dot_dimension_numbers<[1], [0], [0], [1], [0, 0, 1, 1], [], []>} : vector<8x32xbf16>, vector<32x32xbf16>, vector<8x32xf32> -> vector<8x32xf32>
    %36 = arith.index_cast %c0_i32 : i32 to index
    %c0_16 = arith.constant 0 : index
    %c0_17 = arith.constant 0 : index
    %37 = vector.load %arg7[%36, %c0_16, %c0_17] : memref<1x1x32xf32, #tpu.memory_space<vmem>>, vector<1x1x32xf32>
    %38 = vector.shape_cast %37 : vector<1x1x32xf32> to vector<1x32xf32>
    %39 = vector.broadcast %38 : vector<1x32xf32> to vector<8x32xf32>
    %40 = arith.addf %35, %39 : vector<8x32xf32>
    %41 = arith.truncf %40 : vector<8x32xf32> to vector<8x32xbf16>
    %42 = arith.index_cast %c0_i32 : i32 to index
    %c0_18 = arith.constant 0 : index
    %c0_19 = arith.constant 0 : index
    %43 = vector.load %arg5[%42, %c0_18, %c0_19] : memref<1x32x32xbf16, #tpu.memory_space<vmem>>, vector<1x32x32xbf16>
    %44 = vector.shape_cast %43 : vector<1x32x32xbf16> to vector<32x32xbf16>
    %cst_20 = arith.constant dense<0.000000e+00> : vector<8x32xf32>
    %45 = tpu.matmul %26, %44, %cst_20 {dimension_numbers = #tpu.dot_dimension_numbers<[1], [0], [0], [1], [0, 0, 1, 1], [], []>} : vector<8x32xbf16>, vector<32x32xbf16>, vector<8x32xf32> -> vector<8x32xf32>
    %46 = arith.index_cast %c0_i32 : i32 to index
    %c0_21 = arith.constant 0 : index
    %c0_22 = arith.constant 0 : index
    %47 = vector.load %arg8[%46, %c0_21, %c0_22] : memref<1x1x32xf32, #tpu.memory_space<vmem>>, vector<1x1x32xf32>
    %48 = vector.shape_cast %47 : vector<1x1x32xf32> to vector<1x32xf32>
    %49 = vector.broadcast %48 : vector<1x32xf32> to vector<8x32xf32>
    %50 = arith.addf %45, %49 : vector<8x32xf32>
    %51 = arith.truncf %50 : vector<8x32xf32> to vector<8x32xbf16>
    %52 = arith.index_cast %c0_i32 : i32 to index
    %c0_23 = arith.constant 0 : index
    %c0_24 = arith.constant 0 : index
    %53 = vector.load %arg6[%52, %c0_23, %c0_24] : memref<1x32x32xbf16, #tpu.memory_space<vmem>>, vector<1x32x32xbf16>
    %54 = vector.shape_cast %53 : vector<1x32x32xbf16> to vector<32x32xbf16>
    %cst_25 = arith.constant dense<0.000000e+00> : vector<8x32xf32>
    %55 = tpu.matmul %26, %54, %cst_25 {dimension_numbers = #tpu.dot_dimension_numbers<[1], [0], [0], [1], [0, 0, 1, 1], [], []>} : vector<8x32xbf16>, vector<32x32xbf16>, vector<8x32xf32> -> vector<8x32xf32>
    %56 = arith.index_cast %c0_i32 : i32 to index
    %c0_26 = arith.constant 0 : index
    %c0_27 = arith.constant 0 : index
    %57 = vector.load %arg9[%56, %c0_26, %c0_27] : memref<1x1x32xf32, #tpu.memory_space<vmem>>, vector<1x1x32xf32>
    %58 = vector.shape_cast %57 : vector<1x1x32xf32> to vector<1x32xf32>
    %59 = vector.broadcast %58 : vector<1x32xf32> to vector<8x32xf32>
    %60 = arith.addf %55, %59 : vector<8x32xf32>
    %61 = arith.truncf %60 : vector<8x32xf32> to vector<8x32xbf16>
    %62 = vector.extract_strided_slice %41 {offsets = [0, 0], sizes = [8, 8], strides = [1, 1]} : vector<8x32xbf16> to vector<8x8xbf16>
    %63 = vector.extract_strided_slice %51 {offsets = [0, 0], sizes = [8, 8], strides = [1, 1]} : vector<8x32xbf16> to vector<8x8xbf16>
    %64 = vector.extract_strided_slice %61 {offsets = [0, 0], sizes = [8, 8], strides = [1, 1]} : vector<8x32xbf16> to vector<8x8xbf16>
    %cst_28 = arith.constant dense<0.000000e+00> : vector<8x8xf32>
    %65 = tpu.matmul %62, %63, %cst_28 {dimension_numbers = #tpu.dot_dimension_numbers<[1], [1], [0], [0], [0, 0, 1, 0], [], []>} : vector<8x8xbf16>, vector<8x8xbf16>, vector<8x8xf32> -> vector<8x8xf32>
    %cst_29 = arith.constant -1.000000e+30 : f32
    %66 = vector.broadcast %cst_29 : f32 to vector<8x8xf32>
    %67 = arith.select %29, %65, %66 : vector<8x8xi1>, vector<8x8xf32>
    %cst_30 = arith.constant dense<0xFF800000> : vector<8xf32>
    %68 = vector.multi_reduction <maximumf>, %67, %cst_30 [1] : vector<8x8xf32> to vector<8xf32>
    %69 = vector.shape_cast %68 : vector<8xf32> to vector<8x1xf32>
    %70 = vector.broadcast %69 : vector<8x1xf32> to vector<8x8xf32>
    %71 = arith.subf %67, %70 : vector<8x8xf32>
    %72 = math.exp %71 : vector<8x8xf32>
    %cst_31 = arith.constant dense<0.000000e+00> : vector<8xf32>
    %73 = vector.multi_reduction <add>, %72, %cst_31 [1] : vector<8x8xf32> to vector<8xf32>
    %74 = vector.shape_cast %73 : vector<8xf32> to vector<8x1xf32>
    %75 = tpu.reciprocal %74 {approx = true} : vector<8x1xf32> -> vector<8x1xf32>
    %76 = arith.truncf %72 : vector<8x8xf32> to vector<8x8xbf16>
    %cst_32 = arith.constant dense<0.000000e+00> : vector<8x8xf32>
    %77 = tpu.matmul %76, %64, %cst_32 {dimension_numbers = #tpu.dot_dimension_numbers<[1], [0], [0], [1], [0, 0, 1, 1], [], []>} : vector<8x8xbf16>, vector<8x8xbf16>, vector<8x8xf32> -> vector<8x8xf32>
    %78 = vector.broadcast %75 : vector<8x1xf32> to vector<8x8xf32>
    %79 = arith.mulf %77, %78 : vector<8x8xf32>
    %80 = arith.truncf %79 : vector<8x8xf32> to vector<8x8xbf16>
    %81 = vector.extract_strided_slice %41 {offsets = [0, 8], sizes = [8, 8], strides = [1, 1]} : vector<8x32xbf16> to vector<8x8xbf16>
    %82 = vector.extract_strided_slice %51 {offsets = [0, 8], sizes = [8, 8], strides = [1, 1]} : vector<8x32xbf16> to vector<8x8xbf16>
    %83 = vector.extract_strided_slice %61 {offsets = [0, 8], sizes = [8, 8], strides = [1, 1]} : vector<8x32xbf16> to vector<8x8xbf16>
    %cst_33 = arith.constant dense<0.000000e+00> : vector<8x8xf32>
    %84 = tpu.matmul %81, %82, %cst_33 {dimension_numbers = #tpu.dot_dimension_numbers<[1], [1], [0], [0], [0, 0, 1, 0], [], []>} : vector<8x8xbf16>, vector<8x8xbf16>, vector<8x8xf32> -> vector<8x8xf32>
    %cst_34 = arith.constant -1.000000e+30 : f32
    %85 = vector.broadcast %cst_34 : f32 to vector<8x8xf32>
    %86 = arith.select %29, %84, %85 : vector<8x8xi1>, vector<8x8xf32>
    %cst_35 = arith.constant dense<0xFF800000> : vector<8xf32>
    %87 = vector.multi_reduction <maximumf>, %86, %cst_35 [1] : vector<8x8xf32> to vector<8xf32>
    %88 = vector.shape_cast %87 : vector<8xf32> to vector<8x1xf32>
    %89 = vector.broadcast %88 : vector<8x1xf32> to vector<8x8xf32>
    %90 = arith.subf %86, %89 : vector<8x8xf32>
    %91 = math.exp %90 : vector<8x8xf32>
    %cst_36 = arith.constant dense<0.000000e+00> : vector<8xf32>
    %92 = vector.multi_reduction <add>, %91, %cst_36 [1] : vector<8x8xf32> to vector<8xf32>
    %93 = vector.shape_cast %92 : vector<8xf32> to vector<8x1xf32>
    %94 = tpu.reciprocal %93 {approx = true} : vector<8x1xf32> -> vector<8x1xf32>
    %95 = arith.truncf %91 : vector<8x8xf32> to vector<8x8xbf16>
    %cst_37 = arith.constant dense<0.000000e+00> : vector<8x8xf32>
    %96 = tpu.matmul %95, %83, %cst_37 {dimension_numbers = #tpu.dot_dimension_numbers<[1], [0], [0], [1], [0, 0, 1, 1], [], []>} : vector<8x8xbf16>, vector<8x8xbf16>, vector<8x8xf32> -> vector<8x8xf32>
    %97 = vector.broadcast %94 : vector<8x1xf32> to vector<8x8xf32>
    %98 = arith.mulf %96, %97 : vector<8x8xf32>
    %99 = arith.truncf %98 : vector<8x8xf32> to vector<8x8xbf16>
    %100 = vector.extract_strided_slice %41 {offsets = [0, 16], sizes = [8, 8], strides = [1, 1]} : vector<8x32xbf16> to vector<8x8xbf16>
    %101 = vector.extract_strided_slice %51 {offsets = [0, 16], sizes = [8, 8], strides = [1, 1]} : vector<8x32xbf16> to vector<8x8xbf16>
    %102 = vector.extract_strided_slice %61 {offsets = [0, 16], sizes = [8, 8], strides = [1, 1]} : vector<8x32xbf16> to vector<8x8xbf16>
    %cst_38 = arith.constant dense<0.000000e+00> : vector<8x8xf32>
    %103 = tpu.matmul %100, %101, %cst_38 {dimension_numbers = #tpu.dot_dimension_numbers<[1], [1], [0], [0], [0, 0, 1, 0], [], []>} : vector<8x8xbf16>, vector<8x8xbf16>, vector<8x8xf32> -> vector<8x8xf32>
    %cst_39 = arith.constant -1.000000e+30 : f32
    %104 = vector.broadcast %cst_39 : f32 to vector<8x8xf32>
    %105 = arith.select %29, %103, %104 : vector<8x8xi1>, vector<8x8xf32>
    %cst_40 = arith.constant dense<0xFF800000> : vector<8xf32>
    %106 = vector.multi_reduction <maximumf>, %105, %cst_40 [1] : vector<8x8xf32> to vector<8xf32>
    %107 = vector.shape_cast %106 : vector<8xf32> to vector<8x1xf32>
    %108 = vector.broadcast %107 : vector<8x1xf32> to vector<8x8xf32>
    %109 = arith.subf %105, %108 : vector<8x8xf32>
    %110 = math.exp %109 : vector<8x8xf32>
    %cst_41 = arith.constant dense<0.000000e+00> : vector<8xf32>
    %111 = vector.multi_reduction <add>, %110, %cst_41 [1] : vector<8x8xf32> to vector<8xf32>
    %112 = vector.shape_cast %111 : vector<8xf32> to vector<8x1xf32>
    %113 = tpu.reciprocal %112 {approx = true} : vector<8x1xf32> -> vector<8x1xf32>
    %114 = arith.truncf %110 : vector<8x8xf32> to vector<8x8xbf16>
    %cst_42 = arith.constant dense<0.000000e+00> : vector<8x8xf32>
    %115 = tpu.matmul %114, %102, %cst_42 {dimension_numbers = #tpu.dot_dimension_numbers<[1], [0], [0], [1], [0, 0, 1, 1], [], []>} : vector<8x8xbf16>, vector<8x8xbf16>, vector<8x8xf32> -> vector<8x8xf32>
    %116 = vector.broadcast %113 : vector<8x1xf32> to vector<8x8xf32>
    %117 = arith.mulf %115, %116 : vector<8x8xf32>
    %118 = arith.truncf %117 : vector<8x8xf32> to vector<8x8xbf16>
    %119 = vector.extract_strided_slice %41 {offsets = [0, 24], sizes = [8, 8], strides = [1, 1]} : vector<8x32xbf16> to vector<8x8xbf16>
    %120 = vector.extract_strided_slice %51 {offsets = [0, 24], sizes = [8, 8], strides = [1, 1]} : vector<8x32xbf16> to vector<8x8xbf16>
    %121 = vector.extract_strided_slice %61 {offsets = [0, 24], sizes = [8, 8], strides = [1, 1]} : vector<8x32xbf16> to vector<8x8xbf16>
    %cst_43 = arith.constant dense<0.000000e+00> : vector<8x8xf32>
    %122 = tpu.matmul %119, %120, %cst_43 {dimension_numbers = #tpu.dot_dimension_numbers<[1], [1], [0], [0], [0, 0, 1, 0], [], []>} : vector<8x8xbf16>, vector<8x8xbf16>, vector<8x8xf32> -> vector<8x8xf32>
    %cst_44 = arith.constant -1.000000e+30 : f32
    %123 = vector.broadcast %cst_44 : f32 to vector<8x8xf32>
    %124 = arith.select %29, %122, %123 : vector<8x8xi1>, vector<8x8xf32>
    %cst_45 = arith.constant dense<0xFF800000> : vector<8xf32>
    %125 = vector.multi_reduction <maximumf>, %124, %cst_45 [1] : vector<8x8xf32> to vector<8xf32>
    %126 = vector.shape_cast %125 : vector<8xf32> to vector<8x1xf32>
    %127 = vector.broadcast %126 : vector<8x1xf32> to vector<8x8xf32>
    %128 = arith.subf %124, %127 : vector<8x8xf32>
    %129 = math.exp %128 : vector<8x8xf32>
    %cst_46 = arith.constant dense<0.000000e+00> : vector<8xf32>
    %130 = vector.multi_reduction <add>, %129, %cst_46 [1] : vector<8x8xf32> to vector<8xf32>
    %131 = vector.shape_cast %130 : vector<8xf32> to vector<8x1xf32>
    %132 = tpu.reciprocal %131 {approx = true} : vector<8x1xf32> -> vector<8x1xf32>
    %133 = arith.truncf %129 : vector<8x8xf32> to vector<8x8xbf16>
    %cst_47 = arith.constant dense<0.000000e+00> : vector<8x8xf32>
    %134 = tpu.matmul %133, %121, %cst_47 {dimension_numbers = #tpu.dot_dimension_numbers<[1], [0], [0], [1], [0, 0, 1, 1], [], []>} : vector<8x8xbf16>, vector<8x8xbf16>, vector<8x8xf32> -> vector<8x8xf32>
    %135 = vector.broadcast %132 : vector<8x1xf32> to vector<8x8xf32>
    %136 = arith.mulf %134, %135 : vector<8x8xf32>
    %137 = arith.truncf %136 : vector<8x8xf32> to vector<8x8xbf16>
    %138 = tpu.concatenate %80, %99, %118, %137 in 1 : vector<8x8xbf16>, vector<8x8xbf16>, vector<8x8xbf16>, vector<8x8xbf16> -> vector<8x32xbf16>
    %c0_48 = arith.constant 0 : index
    %c0_49 = arith.constant 0 : index
    %139 = vector.load %arg19[%c0_48, %c0_49] : memref<8x32xf32, #tpu.memory_space<vmem>>, vector<8x32xf32>
    %140 = arith.index_cast %c0_i32 : i32 to index
    %c0_50 = arith.constant 0 : index
    %c0_51 = arith.constant 0 : index
    %141 = vector.load %arg10[%140, %c0_50, %c0_51] : memref<1x32x32xbf16, #tpu.memory_space<vmem>>, vector<1x32x32xbf16>
    %142 = vector.shape_cast %141 : vector<1x32x32xbf16> to vector<32x32xbf16>
    %cst_52 = arith.constant dense<0.000000e+00> : vector<8x32xf32>
    %143 = tpu.matmul %138, %142, %cst_52 {dimension_numbers = #tpu.dot_dimension_numbers<[1], [0], [0], [1], [0, 0, 1, 1], [], []>} : vector<8x32xbf16>, vector<32x32xbf16>, vector<8x32xf32> -> vector<8x32xf32>
    %144 = arith.addf %139, %143 : vector<8x32xf32>
    %c0_53 = arith.constant 0 : index
    %c0_54 = arith.constant 0 : index
    %145 = vector.load %arg19[%c0_53, %c0_54] : memref<8x32xf32, #tpu.memory_space<vmem>>, vector<8x32xf32>
    tpu.vector_store %arg19[%c0_53, %c0_54], %144 {strides = array<i32>} : memref<8x32xf32, #tpu.memory_space<vmem>>, vector<8x32xf32>,
    %c1_i32 = arith.constant 1 : i32
    %c0_55 = arith.constant 0 : index
    %c0_56 = arith.constant 0 : index
    %146 = vector.load %arg19[%c0_55, %c0_56] : memref<8x32xf32, #tpu.memory_space<vmem>>, vector<8x32xf32>
    %147 = arith.addf %1, %146 : vector<8x32xf32>
    %c0_57 = arith.constant 0 : index
    %c0_58 = arith.constant 0 : index
    %148 = vector.load %arg11[%c0_57, %c0_58] : memref<1x32xf32, #tpu.memory_space<vmem>>, vector<1x32xf32>
    %149 = vector.broadcast %148 : vector<1x32xf32> to vector<8x32xf32>
    %150 = arith.addf %147, %149 : vector<8x32xf32>
    %c0_59 = arith.constant 0 : index
    %c0_60 = arith.constant 0 : index
    %151 = vector.load %arg12[%c0_59, %c0_60] : memref<1x32xf32, #tpu.memory_space<vmem>>, vector<1x32xf32>
    %c0_61 = arith.constant 0 : index
    %c0_62 = arith.constant 0 : index
    %152 = vector.load %arg13[%c0_61, %c0_62] : memref<1x32xf32, #tpu.memory_space<vmem>>, vector<1x32xf32>
    %cst_63 = arith.constant dense<0.000000e+00> : vector<8xf32>
    %153 = vector.multi_reduction <add>, %150, %cst_63 [1] : vector<8x32xf32> to vector<8xf32>
    %154 = vector.shape_cast %153 : vector<8xf32> to vector<8x1xf32>
    %cst_64 = arith.constant 3.200000e+01 : f32
    %155 = vector.broadcast %cst_64 : f32 to vector<8x1xf32>
    %156 = arith.divf %154, %155 : vector<8x1xf32>
    %157 = arith.mulf %150, %150 : vector<8x32xf32>
    %cst_65 = arith.constant dense<0.000000e+00> : vector<8xf32>
    %158 = vector.multi_reduction <add>, %157, %cst_65 [1] : vector<8x32xf32> to vector<8xf32>
    %159 = vector.shape_cast %158 : vector<8xf32> to vector<8x1xf32>
    %cst_66 = arith.constant 3.200000e+01 : f32
    %160 = vector.broadcast %cst_66 : f32 to vector<8x1xf32>
    %161 = arith.divf %159, %160 : vector<8x1xf32>
    %162 = arith.mulf %156, %156 : vector<8x1xf32>
    %163 = arith.subf %161, %162 : vector<8x1xf32>
    %164 = vector.broadcast %156 : vector<8x1xf32> to vector<8x32xf32>
    %165 = arith.subf %150, %164 : vector<8x32xf32>
    %cst_67 = arith.constant 9.99999974E-6 : f32
    %166 = vector.broadcast %cst_67 : f32 to vector<8x1xf32>
    %167 = arith.addf %163, %166 : vector<8x1xf32>
    %168 = math.rsqrt %167 : vector<8x1xf32>
    %169 = vector.broadcast %168 : vector<8x1xf32> to vector<8x32xf32>
    %170 = arith.mulf %165, %169 : vector<8x32xf32>
    %171 = vector.broadcast %151 : vector<1x32xf32> to vector<8x32xf32>
    %172 = arith.mulf %170, %171 : vector<8x32xf32>
    %173 = vector.broadcast %152 : vector<1x32xf32> to vector<8x32xf32>
    %174 = arith.addf %172, %173 : vector<8x32xf32>
    %175 = arith.truncf %174 : vector<8x32xf32> to vector<8x32xbf16>
    %cst_68 = arith.constant 0.000000e+00 : f32
    %176 = vector.broadcast %cst_68 : f32 to vector<8x32xf32>
    %c0_69 = arith.constant 0 : index
    %c0_70 = arith.constant 0 : index
    %177 = vector.load %arg19[%c0_69, %c0_70] : memref<8x32xf32, #tpu.memory_space<vmem>>, vector<8x32xf32>
    tpu.vector_store %arg19[%c0_69, %c0_70], %176 {strides = array<i32>} : memref<8x32xf32, #tpu.memory_space<vmem>>, vector<8x32xf32>,
    %c0_71 = arith.constant 0 : index
    %c0_72 = arith.constant 0 : index
    %178 = vector.load %arg14[%c0_71, %c0_72] : memref<32x128xbf16, #tpu.memory_space<vmem>>, vector<32x128xbf16>
    %cst_73 = arith.constant dense<0.000000e+00> : vector<8x128xf32>
    %179 = tpu.matmul %175, %178, %cst_73 {dimension_numbers = #tpu.dot_dimension_numbers<[1], [0], [0], [1], [0, 0, 1, 1], [], []>} : vector<8x32xbf16>, vector<32x128xbf16>, vector<8x128xf32> -> vector<8x128xf32>
    %c0_74 = arith.constant 0 : index
    %c0_75 = arith.constant 0 : index
    %180 = vector.load %arg15[%c0_74, %c0_75] : memref<1x128xf32, #tpu.memory_space<vmem>>, vector<1x128xf32>
    %181 = vector.broadcast %180 : vector<1x128xf32> to vector<8x128xf32>
    %182 = arith.addf %179, %181 : vector<8x128xf32>
    %cst_76 = arith.constant 5.000000e-01 : f32
    %183 = vector.broadcast %cst_76 : f32 to vector<8x128xf32>
    %184 = arith.mulf %183, %182 : vector<8x128xf32>
    %cst_77 = arith.constant 4.471500e-02 : f32
    %185 = vector.broadcast %cst_77 : f32 to vector<8x128xf32>
    %186 = arith.mulf %185, %182 : vector<8x128xf32>
    %187 = arith.mulf %186, %182 : vector<8x128xf32>
    %188 = arith.mulf %187, %182 : vector<8x128xf32>
    %189 = arith.addf %182, %188 : vector<8x128xf32>
    %cst_78 = arith.constant 0.797884583 : f32
    %190 = vector.broadcast %cst_78 : f32 to vector<8x128xf32>
    %191 = arith.mulf %190, %189 : vector<8x128xf32>
    %192 = math.tanh %191 : vector<8x128xf32>
    %cst_79 = arith.constant 1.000000e+00 : f32
    %193 = vector.broadcast %cst_79 : f32 to vector<8x128xf32>
    %194 = arith.addf %193, %192 : vector<8x128xf32>
    %195 = arith.mulf %184, %194 : vector<8x128xf32>
    %c0_80 = arith.constant 0 : index
    %c0_81 = arith.constant 0 : index
    %196 = vector.load %arg19[%c0_80, %c0_81] : memref<8x32xf32, #tpu.memory_space<vmem>>, vector<8x32xf32>
    %197 = arith.truncf %195 : vector<8x128xf32> to vector<8x128xbf16>
    %c0_82 = arith.constant 0 : index
    %c0_83 = arith.constant 0 : index
    %198 = vector.load %arg16[%c0_82, %c0_83] : memref<128x32xbf16, #tpu.memory_space<vmem>>, vector<128x32xbf16>
    %cst_84 = arith.constant dense<0.000000e+00> : vector<8x32xf32>
    %199 = tpu.matmul %197, %198, %cst_84 {dimension_numbers = #tpu.dot_dimension_numbers<[1], [0], [0], [1], [0, 0, 1, 1], [], []>} : vector<8x128xbf16>, vector<128x32xbf16>, vector<8x32xf32> -> vector<8x32xf32>
    %200 = arith.addf %196, %199 : vector<8x32xf32>
    %c0_85 = arith.constant 0 : index
    %c0_86 = arith.constant 0 : index
    %201 = vector.load %arg19[%c0_85, %c0_86] : memref<8x32xf32, #tpu.memory_space<vmem>>, vector<8x32xf32>
    tpu.vector_store %arg19[%c0_85, %c0_86], %200 {strides = array<i32>} : memref<8x32xf32, #tpu.memory_space<vmem>>, vector<8x32xf32>,
    %c0_87 = arith.constant 0 : index
    %c0_88 = arith.constant 0 : index
    %202 = vector.load %arg19[%c0_87, %c0_88] : memref<8x32xf32, #tpu.memory_space<vmem>>, vector<8x32xf32>
    %203 = arith.addf %150, %202 : vector<8x32xf32>
    %c0_89 = arith.constant 0 : index
    %c0_90 = arith.constant 0 : index
    %204 = vector.load %arg17[%c0_89, %c0_90] : memref<1x32xf32, #tpu.memory_space<vmem>>, vector<1x32xf32>
    %205 = vector.broadcast %204 : vector<1x32xf32> to vector<8x32xf32>
    %206 = arith.addf %203, %205 : vector<8x32xf32>
    %c0_91 = arith.constant 0 : index
    %c0_92 = arith.constant 0 : index
    %c0_93 = arith.constant 0 : index
    %207 = vector.load %arg18[%c0_91, %c0_92, %c0_93] : memref<1x8x32xf32, #tpu.memory_space<vmem>>, vector<1x8x32xf32>
    %208 = vector.shape_cast %207 : vector<1x8x32xf32> to vector<8x32xf32>
    %209 = vector.shape_cast %206 : vector<8x32xf32> to vector<1x8x32xf32>
    tpu.vector_store %arg18[%c0_91, %c0_92, %c0_93], %209 {strides = array<i32>} : memref<1x8x32xf32, #tpu.memory_space<vmem>>, vector<1x8x32xf32>,
    return
  }
  func.func @transform_0(%arg0: i32) -> (i32, i32, i32) {
    %c0_i32 = arith.constant 0 : i32
    %c0_i32_0 = arith.constant 0 : i32
    %c0_i32_1 = arith.constant 0 : i32
    return %arg0, %c0_i32, %c0_i32_0 : i32, i32, i32
  }
  func.func @transform_1(%arg0: i32) -> (i32, i32) {
    %c0_i32 = arith.constant 0 : i32
    %c0_i32_0 = arith.constant 0 : i32
    %c0_i32_1 = arith.constant 0 : i32
    return %c0_i32, %c0_i32_0 : i32, i32
  }
  func.func @transform_2(%arg0: i32) -> (i32, i32) {
    %c0_i32 = arith.constant 0 : i32
    %c0_i32_0 = arith.constant 0 : i32
    %c0_i32_1 = arith.constant 0 : i32
    return %c0_i32, %c0_i32_0 : i32, i32
  }
  func.func @transform_3(%arg0: i32) -> (i32, i32, i32) {
    %c0_i32 = arith.constant 0 : i32
    %c0_i32_0 = arith.constant 0 : i32
    %c0_i32_1 = arith.constant 0 : i32
    %c0_i32_2 = arith.constant 0 : i32
    return %c0_i32, %c0_i32_0, %c0_i32_1 : i32, i32, i32
  }
  func.func @transform_4(%arg0: i32) -> (i32, i32, i32) {
    %c0_i32 = arith.constant 0 : i32
    %c0_i32_0 = arith.constant 0 : i32
    %c0_i32_1 = arith.constant 0 : i32
    %c0_i32_2 = arith.constant 0 : i32
    return %c0_i32, %c0_i32_0, %c0_i32_1 : i32, i32, i32
  }
  func.func @transform_5(%arg0: i32) -> (i32, i32, i32) {
    %c0_i32 = arith.constant 0 : i32
    %c0_i32_0 = arith.constant 0 : i32
    %c0_i32_1 = arith.constant 0 : i32
    %c0_i32_2 = arith.constant 0 : i32
    return %c0_i32, %c0_i32_0, %c0_i32_1 : i32, i32, i32
  }
  func.func @transform_6(%arg0: i32) -> (i32, i32, i32) {
    %c0_i32 = arith.constant 0 : i32
    %c0_i32_0 = arith.constant 0 : i32
    %c0_i32_1 = arith.constant 0 : i32
    %c0_i32_2 = arith.constant 0 : i32
    return %c0_i32, %c0_i32_0, %c0_i32_1 : i32, i32, i32
  }
  func.func @transform_7(%arg0: i32) -> (i32, i32, i32) {
    %c0_i32 = arith.constant 0 : i32
    %c0_i32_0 = arith.constant 0 : i32
    %c0_i32_1 = arith.constant 0 : i32
    %c0_i32_2 = arith.constant 0 : i32
    return %c0_i32, %c0_i32_0, %c0_i32_1 : i32, i32, i32
  }
  func.func @transform_8(%arg0: i32) -> (i32, i32, i32) {
    %c0_i32 = arith.constant 0 : i32
    %c0_i32_0 = arith.constant 0 : i32
    %c0_i32_1 = arith.constant 0 : i32
    %c0_i32_2 = arith.constant 0 : i32
    return %c0_i32, %c0_i32_0, %c0_i32_1 : i32, i32, i32
  }
  func.func @transform_9(%arg0: i32) -> (i32, i32, i32) {
    %c0_i32 = arith.constant 0 : i32
    %c0_i32_0 = arith.constant 0 : i32
    %c0_i32_1 = arith.constant 0 : i32
    %c0_i32_2 = arith.constant 0 : i32
    return %c0_i32, %c0_i32_0, %c0_i32_1 : i32, i32, i32
  }
  func.func @transform_10(%arg0: i32) -> (i32, i32) {
    %c0_i32 = arith.constant 0 : i32
    %c0_i32_0 = arith.constant 0 : i32
    %c0_i32_1 = arith.constant 0 : i32
    return %c0_i32, %c0_i32_0 : i32, i32
  }
  func.func @transform_11(%arg0: i32) -> (i32, i32) {
    %c0_i32 = arith.constant 0 : i32
    %c0_i32_0 = arith.constant 0 : i32
    %c0_i32_1 = arith.constant 0 : i32
    return %c0_i32, %c0_i32_0 : i32, i32
  }
  func.func @transform_12(%arg0: i32) -> (i32, i32) {
    %c0_i32 = arith.constant 0 : i32
    %c0_i32_0 = arith.constant 0 : i32
    %c0_i32_1 = arith.constant 0 : i32
    return %c0_i32, %c0_i32_0 : i32, i32
  }
  func.func @transform_13(%arg0: i32) -> (i32, i32) {
    %c0_i32 = arith.constant 0 : i32
    %c0_i32_0 = arith.constant 0 : i32
    %c0_i32_1 = arith.constant 0 : i32
    return %c0_i32, %c0_i32_0 : i32, i32
  }
  func.func @transform_14(%arg0: i32) -> (i32, i32) {
    %c0_i32 = arith.constant 0 : i32
    %c0_i32_0 = arith.constant 0 : i32
    %c0_i32_1 = arith.constant 0 : i32
    return %c0_i32, %c0_i32_0 : i32, i32
  }
  func.func @transform_15(%arg0: i32) -> (i32, i32) {
    %c0_i32 = arith.constant 0 : i32
    %c0_i32_0 = arith.constant 0 : i32
    %c0_i32_1 = arith.constant 0 : i32
    return %c0_i32, %c0_i32_0 : i32, i32
  }
  func.func @transform_16(%arg0: i32) -> (i32, i32) {
    %c0_i32 = arith.constant 0 : i32
    %c0_i32_0 = arith.constant 0 : i32
    %c0_i32_1 = arith.constant 0 : i32
    return %c0_i32, %c0_i32_0 : i32, i32
  }
  func.func @transform_17(%arg0: i32) -> (i32, i32, i32) {
    %c0_i32 = arith.constant 0 : i32
    %c0_i32_0 = arith.constant 0 : i32
    %c0_i32_1 = arith.constant 0 : i32
    return %arg0, %c0_i32, %c0_i32_0 : i32, i32, i32
  }
}

</mosaic_0001>

<bundles_post_ra>
// kernel: tpu_custom_call.1
= control target key start
LH: loop header
LB: loop body
LE: loop exit
PB: predicated region body
PF: predicated region fallthrough
CT: control target
= control target key end

     0   :  { %s2010_s0 = inlined_call_operand.vmem [shape: f32[2,8,32], index: 0, kind: input, shape index: {}]   ;;  %s2011_s1 = inlined_call_operand.hbm [shape: f32[1,32], index: 1, kind: input, shape index: {}]   ;;  %s2012_s2 = inlined_call_operand.vmem [shape: f32[1,32], index: 2, kind: input, shape index: {}]   ;;  %s2013_s3 = inlined_call_operand.vmem [shape: bf16[1,32,32], index: 3, kind: input, shape index: {}]   ;;  %s2014_s4 = inlined_call_operand.vmem [shape: bf16[1,32,32], index: 4, kind: input, shape index: {}]   ;;  %s2015_s5 = inlined_call_operand.vmem [shape: bf16[1,32,32], index: 5, kind: input, shape index: {}]   ;;  %s2016_s6 = inlined_call_operand.vmem [shape: f32[1,1,32], index: 6, kind: input, shape index: {}]   ;;  %s2017_s7 = inlined_call_operand.vmem [shape: f32[1,1,32], index: 7, kind: input, shape index: {}]   ;;  %s2018_s8 = inlined_call_operand.vmem [shape: f32[1,1,32], index: 8, kind: input, shape index: {}]   ;;  %s2019_s9 = inlined_call_operand.vmem [shape: bf16[1,32,32], index: 9, kind: input, shape index: {}]   ;;  %s2020_s10 = inlined_call_operand.vmem [shape: f32[1,32], index: 10, kind: input, shape index: {}]   ;;  %s2021_s11 = inlined_call_operand.vmem [shape: f32[1,32], index: 11, kind: input, shape index: {}]   ;;  %s2022_s12 = inlined_call_operand.vmem [shape: f32[1,32], index: 12, kind: input, shape index: {}]   ;;  %s2023_s13 = inlined_call_operand.hbm [shape: bf16[32,128], index: 13, kind: input, shape index: {}]   ;;  %s2024_s14 = inlined_call_operand.vmem [shape: f32[1,128], index: 14, kind: input, shape index: {}]   ;;  %s2025_s15 = inlined_call_operand.vmem [shape: bf16[128,32], index: 15, kind: input, shape index: {}]   ;;  %s2026_s16 = inlined_call_operand.vmem [shape: f32[1,32], index: 16, kind: input, shape index: {}]   ;;  %s2027_s17 = inlined_call_operand.hbm [shape: f32[2,8,32], index: 17, kind: output, shape index: {}]  }
   0x1   :  { %2034 = sst [smem:[#allocation18_spill]] %s2010_s0 }
   0x2   :  { %2035 = sst [smem:[#allocation19_spill]] %s2011_s1 }
   0x3   :  { %2036 = sst [smem:[#allocation20_spill]] %s2012_s2 }
   0x4   :  { %22 = vsyncpa [#allocation4], 0 }
   0x5   :  { %23 = vsyncpa [#allocation7], 0 }
   0x6   :  { %24 = vsyncpa [#allocation5], 0 }
   0x7   :  { %26 = vsyncpa [#allocation5 + $0x1], 0  ;;  %s1756_s24 = smov 0   ;;  %s1758_s25 = smov 0  }
   0x8   :  { %s1760_s26 = smov 0   ;;  %s1762_s27 = smov 0  }
   0x9 LB: > { %2037 = sst [smem:[#allocation12_spill]] %s1640_s24  ;;  %s1777_s28 = sadd.s32 4294967295, %s1652_s27   ;;  %s1652_s27 = sphi %s1762_s27, %s2052_s27   ;;  %s1648_s26 = sphi %s1760_s26, %s2054_s26   ;;  %s1644_s25 = sphi %s1758_s25, %s2056_s25   ;;  %s1640_s24 = sphi %s1756_s24, %s2055_s24  }
   0xa   : > { %2038 = sst [smem:[#allocation13_spill]] %s1648_s26  ;;  %s1301_s29 = sadd.s32 4294967294, %s1652_s27  }
   0xb   : > { %2039 = sst [smem:[#allocation14_spill]] %s1652_s27  ;;  %s1781_s0 = sadd.s32 1, %s1652_s27  }
   0xc   : > { %2040 = sst [smem:[#allocation15_spill]] %s1781_s0  ;;  %s401_s30 = sadd.s32 1, %s1648_s26 }
   0xd   : > { %s398_s18 = ssub.s32 %s1652_s27, %s1781_s0  ;;  %p411_p0 = scmp.ne.s32.totalorder %s1648_s26, %s1644_s25 }
   0xe   : > { %p399_p1 = scmp.eq.s32.totalorder %s398_s18, 0  ;;  %p412_p2 = scmp.eq.s32.totalorder %s1777_s28, 1 }
   0xf   : > { %p417_p3 = scmp.ne.s32.totalorder %s1644_s25, %s1640_s24  ;;  %p418_p4 = scmp.eq.s32.totalorder %s1301_s29, 1 }
  0x10   : > { %s1792_s19 = scalar_select %p399_p1, %s1648_s26, %s401_s30  }
  0x11   : > { %p1794_p5 = por %p412_p2, %p411_p0  ;;  %p1798_p6 = por %p418_p4, %p417_p3 }
  0x12   : > { %2041 = sst [smem:[#allocation16_spill]] %s1792_s19  ;;  %p1302_p7 = scmp.ge.s32.totalorder %s1652_s27, 1 }
  0x13   : > { %s2043_s20 = scalar_select %p1798_p6, 1, 0 }
  0x14   : > { %p425_p8 = scmp.lt.s32.totalorder %s1652_s27, 3  ;;  %p1439_p9 = scmp.eq.s32.totalorder %s1777_s28, 0 }
  0x15   : > { %2044 = sst [smem:[#allocation17_spill]] %s2043_s20  ;;  %s1654_s18 = smov [#allocation3]  }
  0x16   : > { %p1805_p10 = pnand %p1302_p7, %p425_p8  ;;  %s2046_s29 = sld [smem:[#allocation19_spill]] }
  0x17   : > { %s439_s19 = sshll.u32 %s1654_s18, 4  ;;  %s481_s20 = sshll.u32 %s2023_s13, 4  ;;  %s440_s19 = int_to_ptr.vmem [resolvable:$true] %s439_s19  ;;  %s482_s20 = int_to_ptr.hbm [resolvable:$true] %s481_s20 }
  0x18   : > { %p1428_p11 = pneg %p1805_p10  ;;  %s1655_s24 = smov [#allocation6]  }
  0x19   : > { %s483_s27 = sshll.u32 %s1655_s24, 4  ;;  %s1656_s22 = smov 64   ;;  %s484_s27 = int_to_ptr.vmem [resolvable:$true] %s483_s27 }
  0x1a   : > { %p1429_p12 = pnand %p1439_p9, %p1428_p11  ;;  %s1657_s23 = smov 4  }
  0x1b   : > { %515 = sbr.rel (%p1805_p10) target bundleno = 1583 (0x62f), region = 88 }
  0x1c   : > { %s437_s30 = sshll.u32 %s2046_s29, 4  ;;  %s438_s30 = int_to_ptr.hbm [resolvable:$true] %s437_s30 }
  0x1d   : > { %1431 = dma.hbm_to_vmem [thread:$0]  (!%p1429_p12), %s438_s30, 16, %s440_s19, [#allocation4]  }
  0x1e   : > { %1434 = dma.hbm_to_vmem [thread:$0]  (!%p1429_p12), %s482_s20, 256, %s484_s27, [#allocation7], %s1656_s22, %s1656_s22, %s1657_s23  }
  0x20   : > { %1627 = dma.done.wait (%p1439_p9), [#allocation4], 16  }
  0x21   : > { %1629 = vsyncadd (%p1439_p9), [#allocation4], 4294967280 }
  0x22   : > { %1631 = dma.done.wait (%p1439_p9), [#allocation7], 256  }
  0x23   : > { %1633 = vsyncadd (%p1439_p9), [#allocation7], 4294967040  ;;  %p572_p13 = scmp.lt.s32.totalorder %s1777_s28, 1  ;;  %s2047_s19 = sld [smem:[#allocation18_spill]]  ;;  %vm580_vm0 = vcmask 261120   ;;  %v1658_v4 = vmov 32.0  }
  0x24   : > { %1498 = vrcp.f32 %v1658_v4  ;;  %v1401_v10 = vld [vmem:[%s2013_s3 + $0x8] sm:$0xff]  ;;  %v1400_v13 = vld [vmem:[%s2013_s3] sm:$0xff]  ;;  %s2048_s2 = sld [smem:[#allocation20_spill]]  ;;  %vm732_vm5 = vcmask 64512   ;;  %vm767_vm6 = vcmask 1043456   ;;  %s1663_s21 = smov 16  }
  0x25   : > { %s573_s24 = scalar_select %p572_p13, %s1777_s28, 1  ;;  %v1403_v11 = vld [vmem:[%s2014_s4 + $0x8] sm:$0xff]  ;;  %656 = vmatpush.bf16.msra.mxu0 %v1401_v10  ;;  %v1402_v14 = vld [vmem:[%s2014_s4] sm:$0xff]  ;;  %vm987_vm8 = vcmask 130048   ;;  %vm990_vm9 = vcmask 195584  }
  0x26   : > { %690 = vmatpush.bf16.msra.mxu2 %v1403_v11  ;;  %v1405_v20 = vld [vmem:[%s2015_s5 + $0x8] sm:$0xff]  ;;  %v1404_v22 = vld [vmem:[%s2015_s5] sm:$0xff]  ;;  %s1664_s29 = smov 24   ;;  %s1397_s27 = sshll.u32 %s1777_s28, 3 }
  0x27   : > { %s1310_s26 = sshll.u32 %s573_s24, 3  ;;  %v1488_v31 = vld [vmem:[#allocation3] ss:$0 sm:$0xff]  ;;  %v1490_v38 = vld [vmem:[%s2016_s6] ss:$0 sm:$0xff]  ;;  %s1659_s24 = smov 112  }
  0x28   : > { %v1491_v42 = vld [vmem:[%s2017_s7] ss:$0 sm:$0xff] }
  0x29   : > { %s575_s20 = scalar_lea.vmem %s2047_s19, %s1310_s26  ;;  %657 = vmatpush.bf16.msra.mxu0 %v1400_v13  ;;  %s1660_s26 = smov 120   ;;  %v1492_v53 = vld [vmem:[%s2018_s8] ss:$0 sm:$0xff] }
  0x2a   : > { %v1834_v0 = vld [vmem:[%s575_s20] sm:$0xff]  ;;  %v1499_v5 = vpop.eup %1498  ;;  %691 = vmatpush.bf16.msra.mxu2 %v1402_v14  ;;  %s1661_s19 = smov 104   ;;  %s1662_s20 = smov 8  }
  0x2b   : > { %v581_v1 = vsel %vm580_vm0, %v1834_v0, 0.0  ;;  %v592_v2 = vmul.f32 %v1834_v0, %v1834_v0  ;;  %v585_v6 = vmul.f32 32.0, %v1499_v5  ;;  %vm589_vm1 = vweird.f32 %v1499_v5  ;;  %v1489_v34 = vld [vmem:[%s2048_s2] ss:$0 sm:$0xff] }
  0x2c   : > { %582 = vadd.xlane.f32.xlu0 %v581_v1 }
  0x2d   : > { %v593_v3 = vsel %vm580_vm0, %v592_v2, 0.0  ;;  %v586_v7 = vsub.f32 1.0, %v585_v6  ;;  %v621_v6 = vlaneseq }
  0x2e   : > { %724 = vmatpush.bf16.msrb.mxu2 %v1405_v20 }
  0x2f   : > { %v587_v8 = vmul.f32 %v1499_v5, %v586_v7  ;;  %v622_v7 = vshrl.u32 %v621_v6, 7 }
  0x31   : > { %v588_v9 = vadd.f32 %v1499_v5, %v587_v8  ;;  %v624_v8 = vand.u32 127, %v621_v6 }
  0x32   : > { %725 = vmatpush.bf16.msrb.mxu2 %v1404_v22 }
  0x33   : > { %v1853_v15 = vsel %vm589_vm1, %v1499_v5, %v588_v9  ;;  %vm625_vm7 = vcmp.le.s32.totalorder %v624_v8, %v622_v7 }
  0x34   : > { %594 = vadd.xlane.f32.xlu0 %v593_v3 }
  0x9f   : > { %v583_v12 = vpop.xlane.xlu0 %582 }
  0xa0   : > { %v591_v16 = vmul.f32 %v1853_v15, %v583_v12 }
  0xa2   : > { %v597_v18 = vmul.f32 %v591_v16, %v591_v16  ;;  %v599_v30 = vsub.f32 %v1834_v0, %v591_v16 }
  0xa7   : > { %v595_v17 = vpop.xlane.xlu0 %594 }
  0xa8   : > { %v596_v19 = vmul.f32 %v595_v17, %v1853_v15 }
  0xaa   : > { %v598_v21 = vsub.f32 %v596_v19, %v597_v18 }
  0xac   : > { %v600_v23 = vadd.f32 1e-05, %v598_v21 }
  0xae   : > { %1500 = vrsqrt.f32 %v600_v23  ;;  %vm607_vm3 = vweird.f32 %v600_v23 }
  0xb4   : > { %v1501_v24 = vpop.eup %1500 }
  0xb5   : > { %v602_v25 = vmul.f32 %v1501_v24, %v600_v23  ;;  %vm608_vm2 = vweird.f32 %v1501_v24 }
  0xb6   : > { %vm609_vm4 = vmor %vm607_vm3, %vm608_vm2 }
  0xb7   : > { %v603_v26 = vmul.f32 %v1501_v24, %v602_v25 }
  0xb9   : > { %v604_v27 = vmul.f32 0.5, %v603_v26 }
  0xbb   : > { %v605_v28 = vsub.f32 1.5, %v604_v27 }
  0xbd   : > { %v606_v29 = vmul.f32 %v1501_v24, %v605_v28 }
  0xbf   : > { %v610_v32 = vsel %vm609_vm4, %v1501_v24, %v606_v29 }
  0xc0   : > { %v611_v33 = vmul.f32 %v610_v32, %v599_v30 }
  0xc2   : > { %v615_v35 = vmul.f32 %v1488_v31, %v611_v33 }
  0xc4   : > { %v619_v36 = vadd.f32 %v1489_v34, %v615_v35 }
  0xc6   : > { %v620_v37 = vpack.c.bf16 %v619_v36, %v619_v36 }
  0xc8   : > { %1319 = vmatmul.msk.bf16.vlgmr.msra.gmra.mxu0 %vm580_vm0, %v620_v37  ;;  %1328 = vmatmul.msk.bf16.vlgmr.msra.gmra.mxu2 %vm580_vm0, %v620_v37 }
  0xd8   : > { %1337 = vmatmul.msk.bf16.vlgmr.msrb.gmra.mxu2 %vm580_vm0, %v620_v37 }
 0x145   : > { %v659_v39 = vpop.f32.mrf.mxu0 }
 0x146   : > { %v660_v40 = vadd.f32 %v1490_v38, %v659_v39 }
 0x148   : > { %v663_v41 = vpack.c.bf16 %v660_v40, %v660_v40 }
 0x14a   : > { %v787_v43 = vunpack.c.l.b16 %v663_v41 }
 0x14b   : > { %v693_v44 = vpop.f32.mrf.mxu2 }
 0x14c   : > { %v788_v45 = vpack.c.b16 %v787_v43, %v787_v43  ;;  %v694_v46 = vadd.f32 %v1491_v42, %v693_v44 }
 0x14d   : > { %v661_v47 = vpop.f32.mrf.mxu0 }
 0x14e   : > { %v697_v48 = vpack.c.bf16 %v694_v46, %v694_v46  ;;  %853 = vrot.lane.b32.xlu0 %v788_v45, %s1659_s24 }
 0x150   : > { %v792_v49 = vunpack.c.l.b16 %v697_v48  ;;  %v737_v50 = vsel %vm732_vm5, %v697_v48, 0 }
 0x151   : > { %746 = vmatpush.bf16.xpose.msra.mxu3 %v737_v50 }
 0x152   : > { %v793_v51 = vpack.c.b16 %v792_v49, %v792_v49 }
 0x153   : > { %v695_v52 = vpop.f32.mrf.mxu2 }
 0x154   : > { %855 = vrot.lane.b32.xlu2 %v793_v51, %s1659_s24  ;;  %794 = vrot.lane.b32.xlu1 %v793_v51, %s1660_s26 }
 0x158   : > { %1338 = vmatmul.msk.bf16.vlgmr.msra.gmra.mxu3 %vm732_vm5, %v663_v41 }
 0x15b   : > { %v727_v54 = vpop.f32.mrf.mxu2 }
 0x15c   : > { %v728_v55 = vadd.f32 %v1492_v53, %v727_v54  ;;  %913 = vrot.lane.b32.xlu2 %v793_v51, %s1661_s19  ;;  %789 = vrot.lane.b32.xlu1 %v788_v45, %s1660_s26 }
 0x15e   : > { %v731_v56 = vpack.c.bf16 %v728_v55, %v728_v55 }
 0x160   : > { %v828_v57 = vunpack.c.l.b16 %v731_v56  ;;  %v769_v58 = vsel %vm767_vm6, %v731_v56, 0 }
 0x161   : > { %778 = vmatpush.bf16.msrb.mxu0 %v769_v58 }
 0x162   : > { %v829_v59 = vpack.c.b16 %v828_v57, %v828_v57 }
 0x163   : > { %v729_v60 = vpop.f32.mrf.mxu2 }
 0x164   : > { %830 = vrot.lane.b32.xlu0 %v829_v59, %s1660_s26  ;;  %911 = vrot.lane.b32.xlu1 %v788_v45, %s1661_s19 }
 0x1ae   : > { %v856_v61 = vpop.permute.xlu2 %855 }
 0x1af   : > { %v861_v62 = vsel %vm732_vm5, %v856_v61, 0 }
 0x1b0   : > { %870 = vmatpush.bf16.xpose.msrb.mxu3 %v861_v62 }
 0x1b6   : > { %v914_v1 = vpop.permute.xlu2 %913 }
 0x1b7   : > { %v919_v4 = vsel %vm732_vm5, %v914_v1, 0 }
 0x1c0   : > { %v854_v63 = vpop.permute.xlu0 %853 }
 0x1c1   : > { %1342 = vmatmul.msk.bf16.vlgmr.msrb.gmra.mxu3 %vm732_vm5, %v854_v63 }
 0x1c6   : > { %v795_v2 = vpop.permute.xlu1 %794 }
 0x1c7   : > { %v800_v3 = vsel %vm732_vm5, %v795_v2, 0 }
 0x1c8   : > { %809 = vmatpush.bf16.xpose.msra.mxu1 %v800_v3 }
 0x1ce   : > { %v790_v5 = vpop.permute.xlu1 %789 }
 0x1cf   : > { %1340 = vmatmul.msk.bf16.vlgmr.msra.gmra.mxu1 %vm732_vm5, %v790_v5 }
 0x1d0   : > { %928 = vmatpush.bf16.xpose.msrb.mxu1 %v919_v4 }
 0x1d6   : > { %v831_v9 = vpop.permute.xlu0 %830  ;;  %v912_v14 = vpop.permute.xlu1 %911 }
 0x1d7   : > { %v836_v10 = vsel %vm767_vm6, %v831_v9, 0 }
 0x1d8   : > { %845 = vmatpush.bf16.msra.mxu2 %v836_v10 }
 0x1db   : > { %v748_v11 = vpop.f32.mrf.mxu3 }
 0x1dc   : > { %v752_v12 = vsel %vm625_vm7, %v748_v11, -1e+30 }
 0x1dd   : > { %v753_v13 = vsel %vm732_vm5, %v752_v12, -inf }
 0x1de   : > { %754 = vmax.xlane.f32.xlu1 %v753_v13 }
 0x1df   : > { %1344 = vmatmul.msk.bf16.vlgmr.msrb.gmra.mxu1 %vm732_vm5, %v912_v14 }
 0x1e3   : > { %v750_v16 = vpop.f32.mrf.mxu3 }
 0x1f7   : > { %888 = vrot.lane.b32.xlu1 %v829_v59, %s1659_s24  ;;  %s569_s24 = sand.u32 1, %s1644_s25  }
 0x1f8   : > { %s1309_s26 = sshll.u32 %s569_s24, 3  ;;  %s1205_s28 = scalar_lea.sflag [#allocation5], %s569_s24 }
 0x1f9   : > { %s571_s30 = scalar_lea.vmem [#allocation8], %s1309_s26  ;;  %s1602_s26 = scalar_lea.hbm %s2027_s17, 16 }
 0x1fa   : > { %s1217_s18 = sshll.u32 %s571_s30, 4  ;;  %s1218_s18 = int_to_ptr.vmem [resolvable:$true] %s1217_s18 }
 0x244   : > { %v872_v17 = vpop.f32.mrf.mxu3 }
 0x245   : > { %v876_v24 = vsel %vm625_vm7, %v872_v17, -1e+30 }
 0x246   : > { %v877_v27 = vsel %vm732_vm5, %v876_v24, -inf }
 0x24c   : > { %v811_v18 = vpop.f32.mrf.mxu1  ;;  %v874_v19 = vpop.f32.mrf.mxu3 }
 0x24d   : > { %v815_v20 = vsel %vm625_vm7, %v811_v18, -1e+30 }
 0x24e   : > { %v816_v21 = vsel %vm732_vm5, %v815_v20, -inf }
 0x24f   : > { %817 = vmax.xlane.f32.xlu2 %v816_v21  ;;  %v1407_v21 = vld [vmem:[%s2019_s9 + $0x8] sm:$0xff] }
 0x250   : > { %1018 = vmatpush.bf16.msra.mxu3 %v1407_v21 }
 0x251   : > { %v755_v22 = vpop.xlane.xlu1 %754 }
 0x252   : > { %v756_v23 = vsub.f32 %v752_v12, %v755_v22  ;;  %v1406_v22 = vld [vmem:[%s2019_s9] sm:$0xff] }
 0x254   : > { %v757_v25 = vmul.f32 1.442695, %v756_v23  ;;  %v813_v26 = vpop.f32.mrf.mxu1  ;;  %1019 = vmatpush.bf16.msra.mxu3 %v1406_v22  ;;  %v1665_v23 = vmov 0.0  }
 0x255   : > { %626 = vst.msk [vmem:[#allocation2] sm:$0xff] %vm580_vm0, %v1665_v23 }
 0x256   : > { %1502 = vpow2.f32 %v757_v25 }
 0x257   : > { %878 = vmax.xlane.f32.xlu2 %v877_v27 }
 0x25c   : > { %v1503_v28 = vpop.eup %1502  ;;  %v930_v29 = vpop.f32.mrf.mxu1 }
 0x25d   : > { %v934_v30 = vsel %vm625_vm7, %v930_v29, -1e+30  ;;  %v763_v31 = vpack.c.bf16 %v1503_v28, %v1503_v28  ;;  %v759_v52 = vsel %vm732_vm5, %v1503_v28, 0.0 }
 0x25e   : > { %v935_v32 = vsel %vm732_vm5, %v934_v30, -inf }
 0x25f   : > { %936 = vmax.xlane.f32.xlu0 %v935_v32  ;;  %1339 = vmatmul.msk.bf16.vlgmr.msrb.gmra.mxu0 %vm732_vm5, %v763_v31 }
 0x264   : > { %v932_v33 = vpop.f32.mrf.mxu1 }
 0x269   : > { %v889_v34 = vpop.permute.xlu1 %888 }
 0x26a   : > { %v894_v35 = vsel %vm767_vm6, %v889_v34, 0  ;;  %v993_v34 = vld [vmem:[#allocation2] sm:$0xff] }
 0x26b   : > { %903 = vmatpush.bf16.msra.mxu0 %v894_v35 }
 0x26f   : > { %946 = vrot.lane.b32.xlu2 %v829_v59, %s1661_s19 }
 0x2c2   : > { %v818_v36 = vpop.xlane.xlu2 %817 }
 0x2c3   : > { %v819_v37 = vsub.f32 %v815_v20, %v818_v36 }
 0x2c5   : > { %v820_v38 = vmul.f32 1.442695, %v819_v37 }
 0x2c7   : > { %1504 = vpow2.f32 %v820_v38  ;;  %v1493_v38 = vld [vmem:[%s2020_s10] ss:$0 sm:$0xff] }
 0x2ca   : > { %v879_v39 = vpop.xlane.xlu2 %878 }
 0x2cb   : > { %v880_v40 = vsub.f32 %v876_v24, %v879_v39 }
 0x2cd   : > { %v1505_v41 = vpop.eup %1504  ;;  %v881_v42 = vmul.f32 1.442695, %v880_v40 }
 0x2ce   : > { %v826_v43 = vpack.c.bf16 %v1505_v41, %v1505_v41  ;;  %v822_v44 = vsel %vm732_vm5, %v1505_v41, 0.0 }
 0x2cf   : > { %1506 = vpow2.f32 %v881_v42  ;;  %823 = vadd.xlane.f32.xlu0 %v822_v44 }
 0x2d0   : > { %1341 = vmatmul.msk.bf16.vlgmr.msra.gmra.mxu2 %vm732_vm5, %v826_v43 }
 0x2d2   : > { %v937_v45 = vpop.xlane.xlu0 %936  ;;  %v947_v46 = vpop.permute.xlu2 %946 }
 0x2d3   : > { %v938_v47 = vsub.f32 %v934_v30, %v937_v45  ;;  %v952_v48 = vsel %vm767_vm6, %v947_v46, 0  ;;  %v1409_v45 = vld [vmem:[#allocation6 + $0x8] sm:$0xff]  ;;  %v1408_v46 = vld [vmem:[#allocation6] sm:$0xff] }
 0x2d4   : > { %961 = vmatpush.bf16.msrb.mxu2 %v952_v48  ;;  %1099 = vmatpush.bf16.msrb.mxu0 %v1409_v45 }
 0x2d5   : > { %v1507_v49 = vpop.eup %1506  ;;  %v939_v50 = vmul.f32 1.442695, %v938_v47 }
 0x2d6   : > { %v887_v51 = vpack.c.bf16 %v1507_v49, %v1507_v49  ;;  %v883_v53 = vsel %vm732_vm5, %v1507_v49, 0.0 }
 0x2d7   : > { %1508 = vpow2.f32 %v939_v50  ;;  %760 = vadd.xlane.f32.xlu0 %v759_v52  ;;  %884 = vadd.xlane.f32.xlu2 %v883_v53  ;;  %v1416_v53 = vld [vmem:[%s2025_s15 + $0x30] sm:$0xff] }
 0x2d8   : > { %1343 = vmatmul.msk.bf16.vlgmr.msra.gmra.mxu0 %vm732_vm5, %v887_v51  ;;  %v1417_v51 = vld [vmem:[%s2025_s15 + $0x38] sm:$0xff] }
 0x2d9   : > { %1100 = vmatpush.bf16.msrb.mxu0 %v1408_v46  ;;  %1181 = vmatpush.bf16.msra.mxu1 %v1417_v51 }
 0x2dc   : > { %v780_v54 = vpop.f32.mrf.mxu0 }
 0x2dd   : > { %v1509_v55 = vpop.eup %1508  ;;  %1182 = vmatpush.bf16.msra.mxu1 %v1416_v53 }
 0x2de   : > { %v945_v56 = vpack.c.bf16 %v1509_v55, %v1509_v55  ;;  %v941_v57 = vsel %vm732_vm5, %v1509_v55, 0.0 }
 0x2df   : > { %942 = vadd.xlane.f32.xlu1 %v941_v57 }
 0x2e0   : > { %1345 = vmatmul.msk.bf16.vlgmr.msrb.gmra.mxu2 %vm732_vm5, %v945_v56 }
 0x2e4   : > { %v782_v58 = vpop.f32.mrf.mxu0 }
 0x342   : > { %v824_v59 = vpop.xlane.xlu0 %823 }
 0x343   : > { %1510 = vrcp.f32 %v824_v59 }
 0x349   : > { %v1511_v61 = vpop.eup %1510 }
 0x34a   : > { %v885_v60 = vpop.xlane.xlu2 %884  ;;  %v761_v24 = vpop.xlane.xlu0 %760 }
 0x34b   : > { %1512 = vrcp.f32 %v885_v60 }
 0x351   : > { %v1513_v1 = vpop.eup %1512 }
 0x352   : > { %v943_v6 = vpop.xlane.xlu1 %942 }
 0x353   : > { %v847_v62 = vpop.f32.mrf.mxu2  ;;  %1514 = vrcp.f32 %v943_v6  ;;  %v1414_v6 = vld [vmem:[%s2025_s15 + $0x20] sm:$0xff] }
 0x354   : > { %v851_v63 = vmul.f32 %v1511_v61, %v847_v62  ;;  %1516 = vrcp.f32 %v761_v24  ;;  %v1494_v61 = vld [vmem:[%s2021_s11] ss:$0 sm:$0xff] }
 0x355   : > { %v905_v2 = vpop.f32.mrf.mxu0 }
 0x356   : > { %v852_v3 = vpack.c.bf16 %v851_v63, %v851_v63  ;;  %v909_v4 = vmul.f32 %v1513_v1, %v905_v2  ;;  %v1495_v1 = vld [vmem:[%s2022_s12] ss:$0 sm:$0xff] }
 0x358   : > { %v970_v5 = vunpack.c.l.b16 %v852_v3  ;;  %v910_v8 = vpack.c.bf16 %v909_v4, %v909_v4 }
 0x359   : > { %v1515_v13 = vpop.eup %1514 }
 0x35a   : > { %v971_v7 = vpack.c.b16 %v970_v5, %v970_v5  ;;  %v975_v11 = vunpack.c.l.b16 %v910_v8  ;;  %v1517_v26 = vpop.eup %1516  ;;  %v1415_v5 = vld [vmem:[%s2025_s15 + $0x28] sm:$0xff]  ;;  %v1412_v8 = vld [vmem:[%s2025_s15 + $0x10] sm:$0xff] }
 0x35b   : > { %v849_v9 = vpop.f32.mrf.mxu2  ;;  %v784_v28 = vmul.f32 %v1517_v26, %v780_v54  ;;  %1183 = vmatpush.bf16.msra.mxu1 %v1415_v5 }
 0x35c   : > { %972 = vrot.lane.b32.xlu0 %v971_v7, %s1662_s20  ;;  %v976_v12 = vpack.c.b16 %v975_v11, %v975_v11  ;;  %v1413_v7 = vld [vmem:[%s2025_s15 + $0x18] sm:$0xff]  ;;  %v1411_v9 = vld [vmem:[%s2025_s15 + $0x8] sm:$0xff]  ;;  %v1496_v11 = vld [vmem:[%s2024_s14] ss:$0 sm:$0xff]  ;;  %s1215_s20 = scalar_lea.hbm %s2027_s17, %s1397_s27 }
 0x35d   : > { %v907_v10 = vpop.f32.mrf.mxu0  ;;  %v785_v29 = vpack.c.bf16 %v784_v28, %v784_v28  ;;  %s1219_s22 = sshll.u32 %s1215_s20, 4  ;;  %s1220_s22 = int_to_ptr.hbm [resolvable:$true] %s1219_s22 }
 0x35e   : > { %v1410_v10 = vld [vmem:[%s2025_s15] sm:$0xff]  ;;  %s1596_s23 = sshra.s32 %s1220_s22, 4  ;;  %s1597_s23 = int_to_ptr.hbm [resolvable:$true] %s1596_s23 }
 0x35f   : > { %1184 = vmatpush.bf16.msra.mxu1 %v1414_v6  ;;  %s1598_s27 = scalar_lea.hbm %s1597_s23, 8  ;;  %p1603_p3 = scmp.lt.s32.totalorder %s1597_s23, %s2027_s17 }
 0x360   : > { %p1599_p0 = scmp.ne.s32.totalorder %s1597_s23, %s1598_s27  ;;  %p1604_p4 = scmp.lt.s32.totalorder %s1602_s26, %s1598_s27 }
 0x362   : > { %p1600_p1 = pnand %p1599_p0, %p1794_p5  ;;  %p1605_p7 = por %p1604_p4, %p1603_p3 }
 0x363   : > { %v963_v14 = vpop.f32.mrf.mxu2  ;;  %1185 = vmatpush.bf16.msra.mxu1 %v1413_v7 }
 0x364   : > { %v967_v16 = vmul.f32 %v1515_v13, %v963_v14  ;;  %977 = vrot.lane.b32.xlu0 %v976_v12, %s1663_s21  ;;  %p1601_p2 = pneg %p1600_p1 }
 0x366   : > { %v968_v17 = vpack.c.bf16 %v967_v16, %v967_v16  ;;  %p1606_p8 = pnand %p1605_p7, %p1601_p2 }
 0x367   : > { %1186 = vmatpush.bf16.msra.mxu1 %v1412_v8 }
 0x368   : > { %v980_v18 = vunpack.c.l.b16 %v968_v17 }
 0x36a   : > { %v981_v19 = vpack.c.b16 %v980_v18, %v980_v18 }
 0x36b   : > { %v965_v20 = vpop.f32.mrf.mxu2  ;;  %1187 = vmatpush.bf16.msra.mxu1 %v1411_v9 }
 0x36c   : > { %982 = vrot.lane.b32.xlu0 %v981_v19, %s1664_s29 }
 0x36f   : > { %1188 = vmatpush.bf16.msra.mxu1 %v1410_v10 }
 0x3ce   : > { %v973_v25 = vpop.permute.xlu0 %972 }
 0x3cf   : > { %v986_v30 = vsel %vm732_vm5, %v785_v29, %v973_v25 }
 0x3d6   : > { %v978_v27 = vpop.permute.xlu0 %977 }
 0x3d7   : > { %v989_v31 = vsel %vm987_vm8, %v986_v30, %v978_v27  ;;  %v1497_v30 = vld [vmem:[%s2026_s16] ss:$0 sm:$0xff] }
 0x3de   : > { %v983_v32 = vpop.permute.xlu0 %982 }
 0x3df   : > { %v992_v33 = vsel %vm990_vm9, %v989_v31, %v983_v32 }
 0x3e0   : > { %1354 = vmatmul.msk.bf16.vlgmr.msra.gmra.mxu3 %vm580_vm0, %v992_v33 }
 0x463   : > { %v1021_v35 = vpop.f32.mrf.mxu3 }
 0x464   : > { %v1025_v36 = vadd.f32 %v1021_v35, %v993_v34 }
 0x466   : > { %1026 = vst.msk [vmem:[#allocation2] sm:$0xff] %vm580_vm0, %v1025_v36 }
 0x46b   : > { %v1023_v37 = vpop.f32.mrf.mxu3 }
 0x46d   : > { %v1027_v39 = vld [vmem:[#allocation2] sm:$0xff] }
 0x46e   : > { %v1028_v40 = vadd.f32 %v1027_v39, %v1834_v0  ;;  %1069 = vst.msk [vmem:[#allocation2] sm:$0xff] %vm580_vm0, %v1665_v23 }
 0x470   : > { %v1928_v41 = vadd.f32 %v1493_v38, %v1028_v40 }
 0x472   : > { %v1036_v42 = vsel %vm580_vm0, %v1928_v41, 0.0  ;;  %v1040_v43 = vmul.f32 %v1928_v41, %v1928_v41 }
 0x473   : > { %1037 = vadd.xlane.f32.xlu2 %v1036_v42 }
 0x474   : > { %v1041_v44 = vsel %vm580_vm0, %v1040_v43, 0.0 }
 0x475   : > { %1042 = vadd.xlane.f32.xlu1 %v1041_v44  ;;  %v1115_v26 = vld [vmem:[#allocation2] sm:$0xff] }
 0x4e6   : > { %v1038_v47 = vpop.xlane.xlu2 %1037 }
 0x4e7   : > { %v1039_v0 = vmul.f32 %v1038_v47, %v1853_v15 }
 0x4e8   : > { %v1043_v48 = vpop.xlane.xlu1 %1042 }
 0x4e9   : > { %v1045_v49 = vmul.f32 %v1039_v0, %v1039_v0  ;;  %v1044_v50 = vmul.f32 %v1043_v48, %v1853_v15  ;;  %v1047_v60 = vsub.f32 %v1928_v41, %v1039_v0 }
 0x4eb   : > { %v1046_v52 = vsub.f32 %v1044_v50, %v1045_v49 }
 0x4ed   : > { %v1048_v54 = vadd.f32 1e-05, %v1046_v52 }
 0x4ef   : > { %1518 = vrsqrt.f32 %v1048_v54  ;;  %vm1055_vm11 = vweird.f32 %v1048_v54 }
 0x4f5   : > { %v1519_v55 = vpop.eup %1518 }
 0x4f6   : > { %v1050_v56 = vmul.f32 %v1519_v55, %v1048_v54  ;;  %vm1056_vm10 = vweird.f32 %v1519_v55 }
 0x4f7   : > { %vm1057_vm12 = vmor %vm1055_vm11, %vm1056_vm10 }
 0x4f8   : > { %v1051_v57 = vmul.f32 %v1519_v55, %v1050_v56 }
 0x4fa   : > { %v1052_v58 = vmul.f32 0.5, %v1051_v57 }
 0x4fc   : > { %v1053_v59 = vsub.f32 1.5, %v1052_v58 }
 0x4fe   : > { %v1054_v15 = vmul.f32 %v1519_v55, %v1053_v59 }
 0x500   : > { %v1058_v62 = vsel %vm1057_vm12, %v1519_v55, %v1054_v15 }
 0x501   : > { %v1059_v63 = vmul.f32 %v1058_v62, %v1047_v60 }
 0x503   : > { %v1063_v2 = vmul.f32 %v1494_v61, %v1059_v63 }
 0x505   : > { %v1067_v3 = vadd.f32 %v1495_v1, %v1063_v2 }
 0x507   : > { %v1068_v4 = vpack.c.bf16 %v1067_v3, %v1067_v3 }
 0x509   : > { %1363 = vmatmul.msk.bf16.vlgmr.msrb.gmra.mxu0 %vm580_vm0, %v1068_v4 }
 0x586   : > { %v1102_v12 = vpop.f32.mrf.mxu0 }
 0x587   : > { %v1103_v13 = vadd.f32 %v1496_v11, %v1102_v12 }
 0x589   : > { %v1107_v14 = vmul.f32 0.044715, %v1103_v13  ;;  %v1106_v22 = vmul.f32 0.5, %v1103_v13 }
 0x58b   : > { %v1108_v16 = vmul.f32 %v1107_v14, %v1103_v13 }
 0x58d   : > { %v1109_v17 = vmul.f32 %v1108_v16, %v1103_v13 }
 0x58e   : > { %v1104_v18 = vpop.f32.mrf.mxu0 }
 0x58f   : > { %v1110_v19 = vadd.f32 %v1109_v17, %v1103_v13 }
 0x591   : > { %v1111_v20 = vmul.f32 0.7978846, %v1110_v19 }
 0x593   : > { %1520 = vtanh.f32 %v1111_v20 }
 0x599   : > { %v1521_v21 = vpop.eup %1520 }
 0x59a   : > { %v1113_v23 = vadd.f32 1.0, %v1521_v21 }
 0x59c   : > { %v1114_v24 = vmul.f32 %v1113_v23, %v1106_v22 }
 0x59e   : > { %v1116_v25 = vpack.c.bf16 %v1114_v24, %v1114_v24 }
 0x5a0   : > { %1189 = vmatmul.bf16.vlgmr.msra.gmra.mxu1 %v1116_v25 }
 0x61d   : > { %v1190_v27 = vpop.f32.mrf.mxu1 }
 0x61e   : > { %v1194_v28 = vadd.f32 %v1190_v27, %v1115_v26 }
 0x620   : > { %1195 = vst.msk [vmem:[#allocation2] sm:$0xff] %vm580_vm0, %v1194_v28 }
 0x625   : > { %v1192_v29 = vpop.f32.mrf.mxu1 }
 0x627   : > { %v1196_v31 = vld [vmem:[#allocation2] sm:$0xff] }
 0x628   : > { %v1197_v32 = vadd.f32 %v1196_v31, %v1928_v41 }
 0x62a   : > { %v1202_v33 = vadd.f32 %v1497_v30, %v1197_v32 }
 0x62c   : > { %1203 = vst.msk [vmem:[%s571_s30] sm:$0xff] %vm580_vm0, %v1202_v33 }
 0x62d   : > { %1609 = shalt.err (!%p1606_p8)
}
 0x62e   : > { %1426 = dma.vmem_to_hbm [thread:$0]  (%p1794_p5), %s1218_s18, 128, %s1220_s22, %s1205_s28  }
 0x62f PF: > { %s2049_s24 = sld [smem:[#allocation14_spill]] }
 0x630   : > { %s2050_s29 = sld [smem:[#allocation12_spill]] }
 0x635   : > { %p1443_p9 = scmp.ge.s32.totalorder %s2049_s24, 2 }
 0x636   : > { %s1231_s2 = sand.u32 1, %s2050_s29  }
 0x637   : > { %p1436_p10 = pnand %p1443_p9, %p1798_p6  ;;  %s1232_s0 = scalar_lea.sflag [#allocation5], %s1231_s2 }
 0x639   : > { %p1437_p11 = pneg %p1436_p10 }
 0x63b   : > { %1635 = dma.done.wait (%p1437_p11), %s1232_s0, 128  }
 0x63c   : > { %1637 = vsyncadd (%p1437_p11), %s1232_s0, 4294967168  ;;  %s2052_s27 = sld [smem:[#allocation15_spill]]  ;;  %s2055_s24 = smov %s1644_s25 }
 0x63d   : > { %s2053_s23 = sld [smem:[#allocation13_spill]] }
 0x63e   : > { %s2054_s26 = sld [smem:[#allocation16_spill]] }
 0x642   : > { %p29_p12 = scmp.ge.s32.totalorder %s2052_s27, 4  }
 0x643   : > { %s2056_s25 = smov %s2053_s23 }
 0x644   :  { %31 = sbr.rel (!%p29_p12) target bundleno = 9 (0x9), region = 132 }
 0x649   :  { %1238 = vsyncpa [#allocation4], 1 }
 0x64a   :  { %1240 = vsyncpa [#allocation4 + $0x1], 1 }
 0x64b   :  { %1241 = vsyncpa [#allocation7], 1 }
 0x64c   :  { %1242 = vsyncpa [#allocation5], 1 }
 0x64d   :  { %1244 = vsyncpa [#allocation5 + $0x1], 1 }

// kernel: tpu_custom_call.1
= control target key start
LH: loop header
LB: loop body
LE: loop exit
PB: predicated region body
PF: predicated region fallthrough
CT: control target
= control target key end

     0   :  { %s2010_s0 = inlined_call_operand.vmem [shape: f32[2,8,32], index: 0, kind: input, shape index: {}]   ;;  %s2011_s1 = inlined_call_operand.hbm [shape: f32[1,32], index: 1, kind: input, shape index: {}]   ;;  %s2012_s2 = inlined_call_operand.vmem [shape: f32[1,32], index: 2, kind: input, shape index: {}]   ;;  %s2013_s3 = inlined_call_operand.vmem [shape: bf16[1,32,32], index: 3, kind: input, shape index: {}]   ;;  %s2014_s4 = inlined_call_operand.vmem [shape: bf16[1,32,32], index: 4, kind: input, shape index: {}]   ;;  %s2015_s5 = inlined_call_operand.vmem [shape: bf16[1,32,32], index: 5, kind: input, shape index: {}]   ;;  %s2016_s6 = inlined_call_operand.vmem [shape: f32[1,1,32], index: 6, kind: input, shape index: {}]   ;;  %s2017_s7 = inlined_call_operand.vmem [shape: f32[1,1,32], index: 7, kind: input, shape index: {}]   ;;  %s2018_s8 = inlined_call_operand.vmem [shape: f32[1,1,32], index: 8, kind: input, shape index: {}]   ;;  %s2019_s9 = inlined_call_operand.vmem [shape: bf16[1,32,32], index: 9, kind: input, shape index: {}]   ;;  %s2020_s10 = inlined_call_operand.vmem [shape: f32[1,32], index: 10, kind: input, shape index: {}]   ;;  %s2021_s11 = inlined_call_operand.vmem [shape: f32[1,32], index: 11, kind: input, shape index: {}]   ;;  %s2022_s12 = inlined_call_operand.vmem [shape: f32[1,32], index: 12, kind: input, shape index: {}]   ;;  %s2023_s13 = inlined_call_operand.hbm [shape: bf16[32,128], index: 13, kind: input, shape index: {}]   ;;  %s2024_s14 = inlined_call_operand.vmem [shape: f32[1,128], index: 14, kind: input, shape index: {}]   ;;  %s2025_s15 = inlined_call_operand.vmem [shape: bf16[128,32], index: 15, kind: input, shape index: {}]   ;;  %s2026_s16 = inlined_call_operand.vmem [shape: f32[1,32], index: 16, kind: input, shape index: {}]   ;;  %s2027_s17 = inlined_call_operand.hbm [shape: f32[2,8,32], index: 17, kind: output, shape index: {}]  }
   0x1   :  { %2034 = sst [smem:[#allocation18_spill]] %s2010_s0 }
   0x2   :  { %2035 = sst [smem:[#allocation19_spill]] %s2011_s1 }
   0x3   :  { %2036 = sst [smem:[#allocation20_spill]] %s2012_s2 }
   0x4   :  { %22 = vsyncpa [#allocation4], 0 }
   0x5   :  { %23 = vsyncpa [#allocation7], 0 }
   0x6   :  { %24 = vsyncpa [#allocation5], 0 }
   0x7   :  { %26 = vsyncpa [#allocation5 + $0x1], 0  ;;  %s1756_s24 = smov 0   ;;  %s1758_s25 = smov 0  }
   0x8   :  { %s1760_s26 = smov 0   ;;  %s1762_s27 = smov 0  }
   0x9 LB: > { %2037 = sst [smem:[#allocation12_spill]] %s1640_s24  ;;  %s1777_s28 = sadd.s32 4294967295, %s1652_s27   ;;  %s1652_s27 = sphi %s1762_s27, %s2052_s27   ;;  %s1648_s26 = sphi %s1760_s26, %s2054_s26   ;;  %s1644_s25 = sphi %s1758_s25, %s2056_s25   ;;  %s1640_s24 = sphi %s1756_s24, %s2055_s24  }
   0xa   : > { %2038 = sst [smem:[#allocation13_spill]] %s1648_s26  ;;  %s1301_s29 = sadd.s32 4294967294, %s1652_s27  }
   0xb   : > { %2039 = sst [smem:[#allocation14_spill]] %s1652_s27  ;;  %s1781_s0 = sadd.s32 1, %s1652_s27  }
   0xc   : > { %2040 = sst [smem:[#allocation15_spill]] %s1781_s0  ;;  %s401_s30 = sadd.s32 1, %s1648_s26 }
   0xd   : > { %s398_s18 = ssub.s32 %s1652_s27, %s1781_s0  ;;  %p411_p0 = scmp.ne.s32.totalorder %s1648_s26, %s1644_s25 }
   0xe   : > { %p399_p1 = scmp.eq.s32.totalorder %s398_s18, 0  ;;  %p412_p2 = scmp.eq.s32.totalorder %s1777_s28, 1 }
   0xf   : > { %p417_p3 = scmp.ne.s32.totalorder %s1644_s25, %s1640_s24  ;;  %p418_p4 = scmp.eq.s32.totalorder %s1301_s29, 1 }
  0x10   : > { %s1792_s19 = scalar_select %p399_p1, %s1648_s26, %s401_s30  }
  0x11   : > { %p1794_p5 = por %p412_p2, %p411_p0  ;;  %p1798_p6 = por %p418_p4, %p417_p3 }
  0x12   : > { %2041 = sst [smem:[#allocation16_spill]] %s1792_s19  ;;  %p1302_p7 = scmp.ge.s32.totalorder %s1652_s27, 1 }
  0x13   : > { %s2043_s20 = scalar_select %p1798_p6, 1, 0 }
  0x14   : > { %p425_p8 = scmp.lt.s32.totalorder %s1652_s27, 3  ;;  %p1439_p9 = scmp.eq.s32.totalorder %s1777_s28, 0 }
  0x15   : > { %2044 = sst [smem:[#allocation17_spill]] %s2043_s20  ;;  %s1654_s18 = smov [#allocation3]  }
  0x16   : > { %p1805_p10 = pnand %p1302_p7, %p425_p8  ;;  %s2046_s29 = sld [smem:[#allocation19_spill]] }
  0x17   : > { %s439_s19 = sshll.u32 %s1654_s18, 4  ;;  %s481_s20 = sshll.u32 %s2023_s13, 4  ;;  %s440_s19 = int_to_ptr.vmem [resolvable:$true] %s439_s19  ;;  %s482_s20 = int_to_ptr.hbm [resolvable:$true] %s481_s20 }
  0x18   : > { %p1428_p11 = pneg %p1805_p10  ;;  %s1655_s24 = smov [#allocation6]  }
  0x19   : > { %s483_s27 = sshll.u32 %s1655_s24, 4  ;;  %s1656_s22 = smov 64   ;;  %s484_s27 = int_to_ptr.vmem [resolvable:$true] %s483_s27 }
  0x1a   : > { %p1429_p12 = pnand %p1439_p9, %p1428_p11  ;;  %s1657_s23 = smov 4  }
  0x1b   : > { %515 = sbr.rel (%p1805_p10) target bundleno = 1583 (0x62f), region = 88 }
  0x1c   : > { %s437_s30 = sshll.u32 %s2046_s29, 4  ;;  %s438_s30 = int_to_ptr.hbm [resolvable:$true] %s437_s30 }
  0x1d   : > { %1431 = dma.hbm_to_vmem [thread:$0]  (!%p1429_p12), %s438_s30, 16, %s440_s19, [#allocation4]  }
  0x1e   : > { %1434 = dma.hbm_to_vmem [thread:$0]  (!%p1429_p12), %s482_s20, 256, %s484_s27, [#allocation7], %s1656_s22, %s1656_s22, %s1657_s23  }
  0x20   : > { %1627 = dma.done.wait (%p1439_p9), [#allocation4], 16  }
  0x21   : > { %1629 = vsyncadd (%p1439_p9), [#allocation4], 4294967280 }
  0x22   : > { %1631 = dma.done.wait (%p1439_p9), [#allocation7], 256  }
  0x23   : > { %1633 = vsyncadd (%p1439_p9), [#allocation7], 4294967040  ;;  %p572_p13 = scmp.lt.s32.totalorder %s1777_s28, 1  ;;  %s2047_s19 = sld [smem:[#allocation18_spill]]  ;;  %vm580_vm0 = vcmask 261120   ;;  %v1658_v4 = vmov 32.0  }
  0x24   : > { %1498 = vrcp.f32 %v1658_v4  ;;  %v1401_v10 = vld [vmem:[%s2013_s3 + $0x8] sm:$0xff]  ;;  %v1400_v13 = vld [vmem:[%s2013_s3] sm:$0xff]  ;;  %s2048_s2 = sld [smem:[#allocation20_spill]]  ;;  %vm732_vm5 = vcmask 64512   ;;  %vm767_vm6 = vcmask 1043456   ;;  %s1663_s21 = smov 16  }
  0x25   : > { %s573_s24 = scalar_select %p572_p13, %s1777_s28, 1  ;;  %v1403_v11 = vld [vmem:[%s2014_s4 + $0x8] sm:$0xff]  ;;  %656 = vmatpush.bf16.msra.mxu0 %v1401_v10  ;;  %v1402_v14 = vld [vmem:[%s2014_s4] sm:$0xff]  ;;  %vm987_vm8 = vcmask 130048   ;;  %vm990_vm9 = vcmask 195584  }
  0x26   : > { %690 = vmatpush.bf16.msra.mxu2 %v1403_v11  ;;  %v1405_v20 = vld [vmem:[%s2015_s5 + $0x8] sm:$0xff]  ;;  %v1404_v22 = vld [vmem:[%s2015_s5] sm:$0xff]  ;;  %s1664_s29 = smov 24   ;;  %s1397_s27 = sshll.u32 %s1777_s28, 3 }
  0x27   : > { %s1310_s26 = sshll.u32 %s573_s24, 3  ;;  %v1488_v31 = vld [vmem:[#allocation3] ss:$0 sm:$0xff]  ;;  %v1490_v38 = vld [vmem:[%s2016_s6] ss:$0 sm:$0xff]  ;;  %s1659_s24 = smov 112  }
  0x28   : > { %v1491_v42 = vld [vmem:[%s2017_s7] ss:$0 sm:$0xff] }
  0x29   : > { %s575_s20 = scalar_lea.vmem %s2047_s19, %s1310_s26  ;;  %657 = vmatpush.bf16.msra.mxu0 %v1400_v13  ;;  %s1660_s26 = smov 120   ;;  %v1492_v53 = vld [vmem:[%s2018_s8] ss:$0 sm:$0xff] }
  0x2a   : > { %v1834_v0 = vld [vmem:[%s575_s20] sm:$0xff]  ;;  %v1499_v5 = vpop.eup %1498  ;;  %691 = vmatpush.bf16.msra.mxu2 %v1402_v14  ;;  %s1661_s19 = smov 104   ;;  %s1662_s20 = smov 8  }
  0x2b   : > { %v581_v1 = vsel %vm580_vm0, %v1834_v0, 0.0  ;;  %v592_v2 = vmul.f32 %v1834_v0, %v1834_v0  ;;  %v585_v6 = vmul.f32 32.0, %v1499_v5  ;;  %vm589_vm1 = vweird.f32 %v1499_v5  ;;  %v1489_v34 = vld [vmem:[%s2048_s2] ss:$0 sm:$0xff] }
  0x2c   : > { %582 = vadd.xlane.f32.xlu0 %v581_v1 }
  0x2d   : > { %v593_v3 = vsel %vm580_vm0, %v592_v2, 0.0  ;;  %v586_v7 = vsub.f32 1.0, %v585_v6  ;;  %v621_v6 = vlaneseq }
  0x2e   : > { %724 = vmatpush.bf16.msrb.mxu2 %v1405_v20 }
  0x2f   : > { %v587_v8 = vmul.f32 %v1499_v5, %v586_v7  ;;  %v622_v7 = vshrl.u32 %v621_v6, 7 }
  0x31   : > { %v588_v9 = vadd.f32 %v1499_v5, %v587_v8  ;;  %v624_v8 = vand.u32 127, %v621_v6 }
  0x32   : > { %725 = vmatpush.bf16.msrb.mxu2 %v1404_v22 }
  0x33   : > { %v1853_v15 = vsel %vm589_vm1, %v1499_v5, %v588_v9  ;;  %vm625_vm7 = vcmp.le.s32.totalorder %v624_v8, %v622_v7 }
  0x34   : > { %594 = vadd.xlane.f32.xlu0 %v593_v3 }
  0x9f   : > { %v583_v12 = vpop.xlane.xlu0 %582 }
  0xa0   : > { %v591_v16 = vmul.f32 %v1853_v15, %v583_v12 }
  0xa2   : > { %v597_v18 = vmul.f32 %v591_v16, %v591_v16  ;;  %v599_v30 = vsub.f32 %v1834_v0, %v591_v16 }
  0xa7   : > { %v595_v17 = vpop.xlane.xlu0 %594 }
  0xa8   : > { %v596_v19 = vmul.f32 %v595_v17, %v1853_v15 }
  0xaa   : > { %v598_v21 = vsub.f32 %v596_v19, %v597_v18 }
  0xac   : > { %v600_v23 = vadd.f32 1e-05, %v598_v21 }
  0xae   : > { %1500 = vrsqrt.f32 %v600_v23  ;;  %vm607_vm3 = vweird.f32 %v600_v23 }
  0xb4   : > { %v1501_v24 = vpop.eup %1500 }
  0xb5   : > { %v602_v25 = vmul.f32 %v1501_v24, %v600_v23  ;;  %vm608_vm2 = vweird.f32 %v1501_v24 }
  0xb6   : > { %vm609_vm4 = vmor %vm607_vm3, %vm608_vm2 }
  0xb7   : > { %v603_v26 = vmul.f32 %v1501_v24, %v602_v25 }
  0xb9   : > { %v604_v27 = vmul.f32 0.5, %v603_v26 }
  0xbb   : > { %v605_v28 = vsub.f32 1.5, %v604_v27 }
  0xbd   : > { %v606_v29 = vmul.f32 %v1501_v24, %v605_v28 }
  0xbf   : > { %v610_v32 = vsel %vm609_vm4, %v1501_v24, %v606_v29 }
  0xc0   : > { %v611_v33 = vmul.f32 %v610_v32, %v599_v30 }
  0xc2   : > { %v615_v35 = vmul.f32 %v1488_v31, %v611_v33 }
  0xc4   : > { %v619_v36 = vadd.f32 %v1489_v34, %v615_v35 }
  0xc6   : > { %v620_v37 = vpack.c.bf16 %v619_v36, %v619_v36 }
  0xc8   : > { %1319 = vmatmul.msk.bf16.vlgmr.msra.gmra.mxu0 %vm580_vm0, %v620_v37  ;;  %1328 = vmatmul.msk.bf16.vlgmr.msra.gmra.mxu2 %vm580_vm0, %v620_v37 }
  0xd8   : > { %1337 = vmatmul.msk.bf16.vlgmr.msrb.gmra.mxu2 %vm580_vm0, %v620_v37 }
 0x145   : > { %v659_v39 = vpop.f32.mrf.mxu0 }
 0x146   : > { %v660_v40 = vadd.f32 %v1490_v38, %v659_v39 }
 0x148   : > { %v663_v41 = vpack.c.bf16 %v660_v40, %v660_v40 }
 0x14a   : > { %v787_v43 = vunpack.c.l.b16 %v663_v41 }
 0x14b   : > { %v693_v44 = vpop.f32.mrf.mxu2 }
 0x14c   : > { %v788_v45 = vpack.c.b16 %v787_v43, %v787_v43  ;;  %v694_v46 = vadd.f32 %v1491_v42, %v693_v44 }
 0x14d   : > { %v661_v47 = vpop.f32.mrf.mxu0 }
 0x14e   : > { %v697_v48 = vpack.c.bf16 %v694_v46, %v694_v46  ;;  %853 = vrot.lane.b32.xlu0 %v788_v45, %s1659_s24 }
 0x150   : > { %v792_v49 = vunpack.c.l.b16 %v697_v48  ;;  %v737_v50 = vsel %vm732_vm5, %v697_v48, 0 }
 0x151   : > { %746 = vmatpush.bf16.xpose.msra.mxu3 %v737_v50 }
 0x152   : > { %v793_v51 = vpack.c.b16 %v792_v49, %v792_v49 }
 0x153   : > { %v695_v52 = vpop.f32.mrf.mxu2 }
 0x154   : > { %855 = vrot.lane.b32.xlu2 %v793_v51, %s1659_s24  ;;  %794 = vrot.lane.b32.xlu1 %v793_v51, %s1660_s26 }
 0x158   : > { %1338 = vmatmul.msk.bf16.vlgmr.msra.gmra.mxu3 %vm732_vm5, %v663_v41 }
 0x15b   : > { %v727_v54 = vpop.f32.mrf.mxu2 }
 0x15c   : > { %v728_v55 = vadd.f32 %v1492_v53, %v727_v54  ;;  %913 = vrot.lane.b32.xlu2 %v793_v51, %s1661_s19  ;;  %789 = vrot.lane.b32.xlu1 %v788_v45, %s1660_s26 }
 0x15e   : > { %v731_v56 = vpack.c.bf16 %v728_v55, %v728_v55 }
 0x160   : > { %v828_v57 = vunpack.c.l.b16 %v731_v56  ;;  %v769_v58 = vsel %vm767_vm6, %v731_v56, 0 }
 0x161   : > { %778 = vmatpush.bf16.msrb.mxu0 %v769_v58 }
 0x162   : > { %v829_v59 = vpack.c.b16 %v828_v57, %v828_v57 }
 0x163   : > { %v729_v60 = vpop.f32.mrf.mxu2 }
 0x164   : > { %830 = vrot.lane.b32.xlu0 %v829_v59, %s1660_s26  ;;  %911 = vrot.lane.b32.xlu1 %v788_v45, %s1661_s19 }
 0x1ae   : > { %v856_v61 = vpop.permute.xlu2 %855 }
 0x1af   : > { %v861_v62 = vsel %vm732_vm5, %v856_v61, 0 }
 0x1b0   : > { %870 = vmatpush.bf16.xpose.msrb.mxu3 %v861_v62 }
 0x1b6   : > { %v914_v1 = vpop.permute.xlu2 %913 }
 0x1b7   : > { %v919_v4 = vsel %vm732_vm5, %v914_v1, 0 }
 0x1c0   : > { %v854_v63 = vpop.permute.xlu0 %853 }
 0x1c1   : > { %1342 = vmatmul.msk.bf16.vlgmr.msrb.gmra.mxu3 %vm732_vm5, %v854_v63 }
 0x1c6   : > { %v795_v2 = vpop.permute.xlu1 %794 }
 0x1c7   : > { %v800_v3 = vsel %vm732_vm5, %v795_v2, 0 }
 0x1c8   : > { %809 = vmatpush.bf16.xpose.msra.mxu1 %v800_v3 }
 0x1ce   : > { %v790_v5 = vpop.permute.xlu1 %789 }
 0x1cf   : > { %1340 = vmatmul.msk.bf16.vlgmr.msra.gmra.mxu1 %vm732_vm5, %v790_v5 }
 0x1d0   : > { %928 = vmatpush.bf16.xpose.msrb.mxu1 %v919_v4 }
 0x1d6   : > { %v831_v9 = vpop.permute.xlu0 %830  ;;  %v912_v14 = vpop.permute.xlu1 %911 }
 0x1d7   : > { %v836_v10 = vsel %vm767_vm6, %v831_v9, 0 }
 0x1d8   : > { %845 = vmatpush.bf16.msra.mxu2 %v836_v10 }
 0x1db   : > { %v748_v11 = vpop.f32.mrf.mxu3 }
 0x1dc   : > { %v752_v12 = vsel %vm625_vm7, %v748_v11, -1e+30 }
 0x1dd   : > { %v753_v13 = vsel %vm732_vm5, %v752_v12, -inf }
 0x1de   : > { %754 = vmax.xlane.f32.xlu1 %v753_v13 }
 0x1df   : > { %1344 = vmatmul.msk.bf16.vlgmr.msrb.gmra.mxu1 %vm732_vm5, %v912_v14 }
 0x1e3   : > { %v750_v16 = vpop.f32.mrf.mxu3 }
 0x1f7   : > { %888 = vrot.lane.b32.xlu1 %v829_v59, %s1659_s24  ;;  %s569_s24 = sand.u32 1, %s1644_s25  }
 0x1f8   : > { %s1309_s26 = sshll.u32 %s569_s24, 3  ;;  %s1205_s28 = scalar_lea.sflag [#allocation5], %s569_s24 }
 0x1f9   : > { %s571_s30 = scalar_lea.vmem [#allocation8], %s1309_s26  ;;  %s1602_s26 = scalar_lea.hbm %s2027_s17, 16 }
 0x1fa   : > { %s1217_s18 = sshll.u32 %s571_s30, 4  ;;  %s1218_s18 = int_to_ptr.vmem [resolvable:$true] %s1217_s18 }
 0x244   : > { %v872_v17 = vpop.f32.mrf.mxu3 }
 0x245   : > { %v876_v24 = vsel %vm625_vm7, %v872_v17, -1e+30 }
 0x246   : > { %v877_v27 = vsel %vm732_vm5, %v876_v24, -inf }
 0x24c   : > { %v811_v18 = vpop.f32.mrf.mxu1  ;;  %v874_v19 = vpop.f32.mrf.mxu3 }
 0x24d   : > { %v815_v20 = vsel %vm625_vm7, %v811_v18, -1e+30 }
 0x24e   : > { %v816_v21 = vsel %vm732_vm5, %v815_v20, -inf }
 0x24f   : > { %817 = vmax.xlane.f32.xlu2 %v816_v21  ;;  %v1407_v21 = vld [vmem:[%s2019_s9 + $0x8] sm:$0xff] }
 0x250   : > { %1018 = vmatpush.bf16.msra.mxu3 %v1407_v21 }
 0x251   : > { %v755_v22 = vpop.xlane.xlu1 %754 }
 0x252   : > { %v756_v23 = vsub.f32 %v752_v12, %v755_v22  ;;  %v1406_v22 = vld [vmem:[%s2019_s9] sm:$0xff] }
 0x254   : > { %v757_v25 = vmul.f32 1.442695, %v756_v23  ;;  %v813_v26 = vpop.f32.mrf.mxu1  ;;  %1019 = vmatpush.bf16.msra.mxu3 %v1406_v22  ;;  %v1665_v23 = vmov 0.0  }
 0x255   : > { %626 = vst.msk [vmem:[#allocation2] sm:$0xff] %vm580_vm0, %v1665_v23 }
 0x256   : > { %1502 = vpow2.f32 %v757_v25 }
 0x257   : > { %878 = vmax.xlane.f32.xlu2 %v877_v27 }
 0x25c   : > { %v1503_v28 = vpop.eup %1502  ;;  %v930_v29 = vpop.f32.mrf.mxu1 }
 0x25d   : > { %v934_v30 = vsel %vm625_vm7, %v930_v29, -1e+30  ;;  %v763_v31 = vpack.c.bf16 %v1503_v28, %v1503_v28  ;;  %v759_v52 = vsel %vm732_vm5, %v1503_v28, 0.0 }
 0x25e   : > { %v935_v32 = vsel %vm732_vm5, %v934_v30, -inf }
 0x25f   : > { %936 = vmax.xlane.f32.xlu0 %v935_v32  ;;  %1339 = vmatmul.msk.bf16.vlgmr.msrb.gmra.mxu0 %vm732_vm5, %v763_v31 }
 0x264   : > { %v932_v33 = vpop.f32.mrf.mxu1 }
 0x269   : > { %v889_v34 = vpop.permute.xlu1 %888 }
 0x26a   : > { %v894_v35 = vsel %vm767_vm6, %v889_v34, 0  ;;  %v993_v34 = vld [vmem:[#allocation2] sm:$0xff] }
 0x26b   : > { %903 = vmatpush.bf16.msra.mxu0 %v894_v35 }
 0x26f   : > { %946 = vrot.lane.b32.xlu2 %v829_v59, %s1661_s19 }
 0x2c2   : > { %v818_v36 = vpop.xlane.xlu2 %817 }
 0x2c3   : > { %v819_v37 = vsub.f32 %v815_v20, %v818_v36 }
 0x2c5   : > { %v820_v38 = vmul.f32 1.442695, %v819_v37 }
 0x2c7   : > { %1504 = vpow2.f32 %v820_v38  ;;  %v1493_v38 = vld [vmem:[%s2020_s10] ss:$0 sm:$0xff] }
 0x2ca   : > { %v879_v39 = vpop.xlane.xlu2 %878 }
 0x2cb   : > { %v880_v40 = vsub.f32 %v876_v24, %v879_v39 }
 0x2cd   : > { %v1505_v41 = vpop.eup %1504  ;;  %v881_v42 = vmul.f32 1.442695, %v880_v40 }
 0x2ce   : > { %v826_v43 = vpack.c.bf16 %v1505_v41, %v1505_v41  ;;  %v822_v44 = vsel %vm732_vm5, %v1505_v41, 0.0 }
 0x2cf   : > { %1506 = vpow2.f32 %v881_v42  ;;  %823 = vadd.xlane.f32.xlu0 %v822_v44 }
 0x2d0   : > { %1341 = vmatmul.msk.bf16.vlgmr.msra.gmra.mxu2 %vm732_vm5, %v826_v43 }
 0x2d2   : > { %v937_v45 = vpop.xlane.xlu0 %936  ;;  %v947_v46 = vpop.permute.xlu2 %946 }
 0x2d3   : > { %v938_v47 = vsub.f32 %v934_v30, %v937_v45  ;;  %v952_v48 = vsel %vm767_vm6, %v947_v46, 0  ;;  %v1409_v45 = vld [vmem:[#allocation6 + $0x8] sm:$0xff]  ;;  %v1408_v46 = vld [vmem:[#allocation6] sm:$0xff] }
 0x2d4   : > { %961 = vmatpush.bf16.msrb.mxu2 %v952_v48  ;;  %1099 = vmatpush.bf16.msrb.mxu0 %v1409_v45 }
 0x2d5   : > { %v1507_v49 = vpop.eup %1506  ;;  %v939_v50 = vmul.f32 1.442695, %v938_v47 }
 0x2d6   : > { %v887_v51 = vpack.c.bf16 %v1507_v49, %v1507_v49  ;;  %v883_v53 = vsel %vm732_vm5, %v1507_v49, 0.0 }
 0x2d7   : > { %1508 = vpow2.f32 %v939_v50  ;;  %760 = vadd.xlane.f32.xlu0 %v759_v52  ;;  %884 = vadd.xlane.f32.xlu2 %v883_v53  ;;  %v1416_v53 = vld [vmem:[%s2025_s15 + $0x30] sm:$0xff] }
 0x2d8   : > { %1343 = vmatmul.msk.bf16.vlgmr.msra.gmra.mxu0 %vm732_vm5, %v887_v51  ;;  %v1417_v51 = vld [vmem:[%s2025_s15 + $0x38] sm:$0xff] }
 0x2d9   : > { %1100 = vmatpush.bf16.msrb.mxu0 %v1408_v46  ;;  %1181 = vmatpush.bf16.msra.mxu1 %v1417_v51 }
 0x2dc   : > { %v780_v54 = vpop.f32.mrf.mxu0 }
 0x2dd   : > { %v1509_v55 = vpop.eup %1508  ;;  %1182 = vmatpush.bf16.msra.mxu1 %v1416_v53 }
 0x2de   : > { %v945_v56 = vpack.c.bf16 %v1509_v55, %v1509_v55  ;;  %v941_v57 = vsel %vm732_vm5, %v1509_v55, 0.0 }
 0x2df   : > { %942 = vadd.xlane.f32.xlu1 %v941_v57 }
 0x2e0   : > { %1345 = vmatmul.msk.bf16.vlgmr.msrb.gmra.mxu2 %vm732_vm5, %v945_v56 }
 0x2e4   : > { %v782_v58 = vpop.f32.mrf.mxu0 }
 0x342   : > { %v824_v59 = vpop.xlane.xlu0 %823 }
 0x343   : > { %1510 = vrcp.f32 %v824_v59 }
 0x349   : > { %v1511_v61 = vpop.eup %1510 }
 0x34a   : > { %v885_v60 = vpop.xlane.xlu2 %884  ;;  %v761_v24 = vpop.xlane.xlu0 %760 }
 0x34b   : > { %1512 = vrcp.f32 %v885_v60 }
 0x351   : > { %v1513_v1 = vpop.eup %1512 }
 0x352   : > { %v943_v6 = vpop.xlane.xlu1 %942 }
 0x353   : > { %v847_v62 = vpop.f32.mrf.mxu2  ;;  %1514 = vrcp.f32 %v943_v6  ;;  %v1414_v6 = vld [vmem:[%s2025_s15 + $0x20] sm:$0xff] }
 0x354   : > { %v851_v63 = vmul.f32 %v1511_v61, %v847_v62  ;;  %1516 = vrcp.f32 %v761_v24  ;;  %v1494_v61 = vld [vmem:[%s2021_s11] ss:$0 sm:$0xff] }
 0x355   : > { %v905_v2 = vpop.f32.mrf.mxu0 }
 0x356   : > { %v852_v3 = vpack.c.bf16 %v851_v63, %v851_v63  ;;  %v909_v4 = vmul.f32 %v1513_v1, %v905_v2  ;;  %v1495_v1 = vld [vmem:[%s2022_s12] ss:$0 sm:$0xff] }
 0x358   : > { %v970_v5 = vunpack.c.l.b16 %v852_v3  ;;  %v910_v8 = vpack.c.bf16 %v909_v4, %v909_v4 }
 0x359   : > { %v1515_v13 = vpop.eup %1514 }
 0x35a   : > { %v971_v7 = vpack.c.b16 %v970_v5, %v970_v5  ;;  %v975_v11 = vunpack.c.l.b16 %v910_v8  ;;  %v1517_v26 = vpop.eup %1516  ;;  %v1415_v5 = vld [vmem:[%s2025_s15 + $0x28] sm:$0xff]  ;;  %v1412_v8 = vld [vmem:[%s2025_s15 + $0x10] sm:$0xff] }
 0x35b   : > { %v849_v9 = vpop.f32.mrf.mxu2  ;;  %v784_v28 = vmul.f32 %v1517_v26, %v780_v54  ;;  %1183 = vmatpush.bf16.msra.mxu1 %v1415_v5 }
 0x35c   : > { %972 = vrot.lane.b32.xlu0 %v971_v7, %s1662_s20  ;;  %v976_v12 = vpack.c.b16 %v975_v11, %v975_v11  ;;  %v1413_v7 = vld [vmem:[%s2025_s15 + $0x18] sm:$0xff]  ;;  %v1411_v9 = vld [vmem:[%s2025_s15 + $0x8] sm:$0xff]  ;;  %v1496_v11 = vld [vmem:[%s2024_s14] ss:$0 sm:$0xff]  ;;  %s1215_s20 = scalar_lea.hbm %s2027_s17, %s1397_s27 }
 0x35d   : > { %v907_v10 = vpop.f32.mrf.mxu0  ;;  %v785_v29 = vpack.c.bf16 %v784_v28, %v784_v28  ;;  %s1219_s22 = sshll.u32 %s1215_s20, 4  ;;  %s1220_s22 = int_to_ptr.hbm [resolvable:$true] %s1219_s22 }
 0x35e   : > { %v1410_v10 = vld [vmem:[%s2025_s15] sm:$0xff]  ;;  %s1596_s23 = sshra.s32 %s1220_s22, 4  ;;  %s1597_s23 = int_to_ptr.hbm [resolvable:$true] %s1596_s23 }
 0x35f   : > { %1184 = vmatpush.bf16.msra.mxu1 %v1414_v6  ;;  %s1598_s27 = scalar_lea.hbm %s1597_s23, 8  ;;  %p1603_p3 = scmp.lt.s32.totalorder %s1597_s23, %s2027_s17 }
 0x360   : > { %p1599_p0 = scmp.ne.s32.totalorder %s1597_s23, %s1598_s27  ;;  %p1604_p4 = scmp.lt.s32.totalorder %s1602_s26, %s1598_s27 }
 0x362   : > { %p1600_p1 = pnand %p1599_p0, %p1794_p5  ;;  %p1605_p7 = por %p1604_p4, %p1603_p3 }
 0x363   : > { %v963_v14 = vpop.f32.mrf.mxu2  ;;  %1185 = vmatpush.bf16.msra.mxu1 %v1413_v7 }
 0x364   : > { %v967_v16 = vmul.f32 %v1515_v13, %v963_v14  ;;  %977 = vrot.lane.b32.xlu0 %v976_v12, %s1663_s21  ;;  %p1601_p2 = pneg %p1600_p1 }
 0x366   : > { %v968_v17 = vpack.c.bf16 %v967_v16, %v967_v16  ;;  %p1606_p8 = pnand %p1605_p7, %p1601_p2 }
 0x367   : > { %1186 = vmatpush.bf16.msra.mxu1 %v1412_v8 }
 0x368   : > { %v980_v18 = vunpack.c.l.b16 %v968_v17 }
 0x36a   : > { %v981_v19 = vpack.c.b16 %v980_v18, %v980_v18 }
 0x36b   : > { %v965_v20 = vpop.f32.mrf.mxu2  ;;  %1187 = vmatpush.bf16.msra.mxu1 %v1411_v9 }
 0x36c   : > { %982 = vrot.lane.b32.xlu0 %v981_v19, %s1664_s29 }
 0x36f   : > { %1188 = vmatpush.bf16.msra.mxu1 %v1410_v10 }
 0x3ce   : > { %v973_v25 = vpop.permute.xlu0 %972 }
 0x3cf   : > { %v986_v30 = vsel %vm732_vm5, %v785_v29, %v973_v25 }
 0x3d6   : > { %v978_v27 = vpop.permute.xlu0 %977 }
 0x3d7   : > { %v989_v31 = vsel %vm987_vm8, %v986_v30, %v978_v27  ;;  %v1497_v30 = vld [vmem:[%s2026_s16] ss:$0 sm:$0xff] }
 0x3de   : > { %v983_v32 = vpop.permute.xlu0 %982 }
 0x3df   : > { %v992_v33 = vsel %vm990_vm9, %v989_v31, %v983_v32 }
 0x3e0   : > { %1354 = vmatmul.msk.bf16.vlgmr.msra.gmra.mxu3 %vm580_vm0, %v992_v33 }
 0x463   : > { %v1021_v35 = vpop.f32.mrf.mxu3 }
 0x464   : > { %v1025_v36 = vadd.f32 %v1021_v35, %v993_v34 }
 0x466   : > { %1026 = vst.msk [vmem:[#allocation2] sm:$0xff] %vm580_vm0, %v1025_v36 }
 0x46b   : > { %v1023_v37 = vpop.f32.mrf.mxu3 }
 0x46d   : > { %v1027_v39 = vld [vmem:[#allocation2] sm:$0xff] }
 0x46e   : > { %v1028_v40 = vadd.f32 %v1027_v39, %v1834_v0  ;;  %1069 = vst.msk [vmem:[#allocation2] sm:$0xff] %vm580_vm0, %v1665_v23 }
 0x470   : > { %v1928_v41 = vadd.f32 %v1493_v38, %v1028_v40 }
 0x472   : > { %v1036_v42 = vsel %vm580_vm0, %v1928_v41, 0.0  ;;  %v1040_v43 = vmul.f32 %v1928_v41, %v1928_v41 }
 0x473   : > { %1037 = vadd.xlane.f32.xlu2 %v1036_v42 }
 0x474   : > { %v1041_v44 = vsel %vm580_vm0, %v1040_v43, 0.0 }
 0x475   : > { %1042 = vadd.xlane.f32.xlu1 %v1041_v44  ;;  %v1115_v26 = vld [vmem:[#allocation2] sm:$0xff] }
 0x4e6   : > { %v1038_v47 = vpop.xlane.xlu2 %1037 }
 0x4e7   : > { %v1039_v0 = vmul.f32 %v1038_v47, %v1853_v15 }
 0x4e8   : > { %v1043_v48 = vpop.xlane.xlu1 %1042 }
 0x4e9   : > { %v1045_v49 = vmul.f32 %v1039_v0, %v1039_v0  ;;  %v1044_v50 = vmul.f32 %v1043_v48, %v1853_v15  ;;  %v1047_v60 = vsub.f32 %v1928_v41, %v1039_v0 }
 0x4eb   : > { %v1046_v52 = vsub.f32 %v1044_v50, %v1045_v49 }
 0x4ed   : > { %v1048_v54 = vadd.f32 1e-05, %v1046_v52 }
 0x4ef   : > { %1518 = vrsqrt.f32 %v1048_v54  ;;  %vm1055_vm11 = vweird.f32 %v1048_v54 }
 0x4f5   : > { %v1519_v55 = vpop.eup %1518 }
 0x4f6   : > { %v1050_v56 = vmul.f32 %v1519_v55, %v1048_v54  ;;  %vm1056_vm10 = vweird.f32 %v1519_v55 }
 0x4f7   : > { %vm1057_vm12 = vmor %vm1055_vm11, %vm1056_vm10 }
 0x4f8   : > { %v1051_v57 = vmul.f32 %v1519_v55, %v1050_v56 }
 0x4fa   : > { %v1052_v58 = vmul.f32 0.5, %v1051_v57 }
 0x4fc   : > { %v1053_v59 = vsub.f32 1.5, %v1052_v58 }
 0x4fe   : > { %v1054_v15 = vmul.f32 %v1519_v55, %v1053_v59 }
 0x500   : > { %v1058_v62 = vsel %vm1057_vm12, %v1519_v55, %v1054_v15 }
 0x501   : > { %v1059_v63 = vmul.f32 %v1058_v62, %v1047_v60 }
 0x503   : > { %v1063_v2 = vmul.f32 %v1494_v61, %v1059_v63 }
 0x505   : > { %v1067_v3 = vadd.f32 %v1495_v1, %v1063_v2 }
 0x507   : > { %v1068_v4 = vpack.c.bf16 %v1067_v3, %v1067_v3 }
 0x509   : > { %1363 = vmatmul.msk.bf16.vlgmr.msrb.gmra.mxu0 %vm580_vm0, %v1068_v4 }
 0x586   : > { %v1102_v12 = vpop.f32.mrf.mxu0 }
 0x587   : > { %v1103_v13 = vadd.f32 %v1496_v11, %v1102_v12 }
 0x589   : > { %v1107_v14 = vmul.f32 0.044715, %v1103_v13  ;;  %v1106_v22 = vmul.f32 0.5, %v1103_v13 }
 0x58b   : > { %v1108_v16 = vmul.f32 %v1107_v14, %v1103_v13 }
 0x58d   : > { %v1109_v17 = vmul.f32 %v1108_v16, %v1103_v13 }
 0x58e   : > { %v1104_v18 = vpop.f32.mrf.mxu0 }
 0x58f   : > { %v1110_v19 = vadd.f32 %v1109_v17, %v1103_v13 }
 0x591   : > { %v1111_v20 = vmul.f32 0.7978846, %v1110_v19 }
 0x593   : > { %1520 = vtanh.f32 %v1111_v20 }
 0x599   : > { %v1521_v21 = vpop.eup %1520 }
 0x59a   : > { %v1113_v23 = vadd.f32 1.0, %v1521_v21 }
 0x59c   : > { %v1114_v24 = vmul.f32 %v1113_v23, %v1106_v22 }
 0x59e   : > { %v1116_v25 = vpack.c.bf16 %v1114_v24, %v1114_v24 }
 0x5a0   : > { %1189 = vmatmul.bf16.vlgmr.msra.gmra.mxu1 %v1116_v25 }
 0x61d   : > { %v1190_v27 = vpop.f32.mrf.mxu1 }
 0x61e   : > { %v1194_v28 = vadd.f32 %v1190_v27, %v1115_v26 }
 0x620   : > { %1195 = vst.msk [vmem:[#allocation2] sm:$0xff] %vm580_vm0, %v1194_v28 }
 0x625   : > { %v1192_v29 = vpop.f32.mrf.mxu1 }
 0x627   : > { %v1196_v31 = vld [vmem:[#allocation2] sm:$0xff] }
 0x628   : > { %v1197_v32 = vadd.f32 %v1196_v31, %v1928_v41 }
 0x62a   : > { %v1202_v33 = vadd.f32 %v1497_v30, %v1197_v32 }
 0x62c   : > { %1203 = vst.msk [vmem:[%s571_s30] sm:$0xff] %vm580_vm0, %v1202_v33 }
 0x62d   : > { %1609 = shalt.err (!%p1606_p8)
}
 0x62e   : > { %1426 = dma.vmem_to_hbm [thread:$0]  (%p1794_p5), %s1218_s18, 128, %s1220_s22, %s1205_s28  }
 0x62f PF: > { %s2049_s24 = sld [smem:[#allocation14_spill]] }
 0x630   : > { %s2050_s29 = sld [smem:[#allocation12_spill]] }
 0x635   : > { %p1443_p9 = scmp.ge.s32.totalorder %s2049_s24, 2 }
 0x636   : > { %s1231_s2 = sand.u32 1, %s2050_s29  }
 0x637   : > { %p1436_p10 = pnand %p1443_p9, %p1798_p6  ;;  %s1232_s0 = scalar_lea.sflag [#allocation5], %s1231_s2 }
 0x639   : > { %p1437_p11 = pneg %p1436_p10 }
 0x63b   : > { %1635 = dma.done.wait (%p1437_p11), %s1232_s0, 128  }
 0x63c   : > { %1637 = vsyncadd (%p1437_p11), %s1232_s0, 4294967168  ;;  %s2052_s27 = sld [smem:[#allocation15_spill]]  ;;  %s2055_s24 = smov %s1644_s25 }
 0x63d   : > { %s2053_s23 = sld [smem:[#allocation13_spill]] }
 0x63e   : > { %s2054_s26 = sld [smem:[#allocation16_spill]] }
 0x642   : > { %p29_p12 = scmp.ge.s32.totalorder %s2052_s27, 4  }
 0x643   : > { %s2056_s25 = smov %s2053_s23 }
 0x644   :  { %31 = sbr.rel (!%p29_p12) target bundleno = 9 (0x9), region = 132 }
 0x649   :  { %1238 = vsyncpa [#allocation4], 1 }
 0x64a   :  { %1240 = vsyncpa [#allocation4 + $0x1], 1 }
 0x64b   :  { %1241 = vsyncpa [#allocation7], 1 }
 0x64c   :  { %1242 = vsyncpa [#allocation5], 1 }
 0x64d   :  { %1244 = vsyncpa [#allocation5 + $0x1], 1 }

</bundles_post_ra>
